<compile_context>
chip_gen: v6e
topology: v6e:2x2x1
jax: 0.10.0
libtpu: 0.0.40
codegen_flags: <defaults>
</compile_context>

<pallas_src>
import functools

import jax
import jax.numpy as jnp
from jax.experimental import pallas as pl
from jax.experimental.pallas import tpu as pltpu


def _up_fused_kernel(x1_ref, x2_ref, w_ref, b_ref, ksel_ref, o_ref, *,
                     oy0, ox0, uy0, ux0, hh, ww):
    """One batch element per grid step.

    x1_ref  : (1, H1, W1, Cin)   bf16  input to the transpose-conv
    x2_ref  : (1, H2, W2, Cout)  f32   skip connection (also defines output frame)
    w_ref   : (Cin, 4*Cout)      bf16  conv-transpose weight, cols ordered (kh, kw, co)
    b_ref   : (1, Cout)          f32   bias
    ksel_ref: (2H1*2W1, 1)       i32   per output pixel: k = 2*(row&1) + (col&1)
    o_ref   : (1, H2, W2, Cout)  f32   output  (= x2 + pad(conv_transpose(x1)))
    """
    H1, W1, Cin = x1_ref.shape[1], x1_ref.shape[2], x1_ref.shape[3]
    H2, W2, Cout = o_ref.shape[1], o_ref.shape[2], o_ref.shape[3]
    Ho, Wo = 2 * H1, 2 * W1

    # ---- ConvTranspose2d(k=2, s=2) as ONE MXU matmul ------------------------
    # Nearest-neighbour replicate the input pixels onto the 2x-upsampled grid
    # (major/sublane broadcasts + leading-dim reshapes only; last dim preserved).
    x = x1_ref[0]                                                     # (H1, W1, Cin) bf16
    xr = jnp.broadcast_to(x[:, None, :, :], (H1, 2, W1, Cin)).reshape(Ho, W1, Cin)
    xu = jnp.broadcast_to(xr[:, :, None, :], (Ho, W1, 2, Cin)).reshape(Ho * Wo, Cin)

    # Single fused matmul over all four (kh, kw) taps; f32 accumulation.
    y = jnp.dot(xu, w_ref[...], preferred_element_type=jnp.float32)  # (Ho*Wo, 4*Cout)

    # Per-pixel tap select (register resident, VPU): k = 2*(row parity) + (col parity).
    k = ksel_ref[...]                                                 # (Ho*Wo, 1) int32
    y00 = y[:, 0 * Cout:1 * Cout]
    y01 = y[:, 1 * Cout:2 * Cout]
    y10 = y[:, 2 * Cout:3 * Cout]
    y11 = y[:, 3 * Cout:4 * Cout]
    up = jnp.where(k == 0, y00,
         jnp.where(k == 1, y01,
         jnp.where(k == 2, y10, y11)))                                # (Ho*Wo, Cout) f32

    up = (up + b_ref[...]).reshape(Ho, Wo, Cout)                      # bias in f32

    # ---- fused F.pad(...) + skip-add, single contiguous store ---------------
    full = (oy0 == 0 and ox0 == 0 and uy0 == 0 and ux0 == 0
            and hh == H2 and ww == W2 and hh == Ho and ww == Wo)
    if full:
        # common UNet case: upsampled x1 exactly matches x2 -> one full store
        o_ref[...] = (x2_ref[0] + up).reshape(1, H2, W2, Cout).astype(o_ref.dtype)
    else:
        # general case: x2 is (slightly) larger; border rows/cols are x2 only.
        o_ref[...] = x2_ref[...]
        if hh > 0 and ww > 0:
            win = (x2_ref[0, oy0:oy0 + hh, ox0:ox0 + ww, :]
                   + up[uy0:uy0 + hh, ux0:ux0 + ww, :])
            o_ref[0, oy0:oy0 + hh, ox0:ox0 + ww, :] = win.astype(o_ref.dtype)


def up_forward(x1, x2, weight, bias):
    """Pallas implementation of up.forward.

    x1     : (N, Cin, H1, W1)   float32
    x2     : (N, Cout, H2, W2)  float32   (Cout = Cin // 2)
    weight : (Cin, Cout, 2, 2)  float32   (PyTorch ConvTranspose2d layout)
    bias   : (Cout,)            float32
    returns: (N, Cout, H2, W2)  float32   = x2 + F.pad(conv_transpose(x1))
    """
    N, Cin, H1, W1 = x1.shape
    N2, Cout, H2, W2 = x2.shape
    assert N2 == N and Cout == Cin // 2
    assert weight.shape == (Cin, Cout, 2, 2) and bias.shape == (Cout,)
    Ho, Wo = 2 * H1, 2 * W1

    # Static F.pad window arithmetic (matches PyTorch; negative pad == crop).
    diffY, diffX = H2 - Ho, W2 - Wo
    py0, px0 = diffY // 2, diffX // 2
    oy0, uy0 = max(py0, 0), max(-py0, 0)
    ox0, ux0 = max(px0, 0), max(-px0, 0)
    hh = min(H2 - oy0, Ho - uy0)
    ww = min(W2 - ox0, Wo - ux0)

    # Layout plumbing (plain XLA): NCHW -> NHWC; bf16 for MXU operands.
    x1_nhwc = jnp.transpose(x1, (0, 2, 3, 1)).astype(jnp.bfloat16)        # (N, H1, W1, Cin)
    x2_nhwc = jnp.transpose(x2, (0, 2, 3, 1))                             # (N, H2, W2, Cout)
    w_big = jnp.transpose(weight, (0, 2, 3, 1)).reshape(Cin, 4 * Cout)    # cols (kh, kw, co)
    w_big = w_big.astype(jnp.bfloat16)
    b2 = bias.reshape(1, Cout).astype(jnp.float32)

    # Per-output-pixel tap id (hoisted out of the kernel: no in-kernel iota/div).
    m = jnp.arange(Ho * Wo, dtype=jnp.int32)
    ksel = (2 * ((m // Wo) % 2) + (m % 2)).astype(jnp.int32).reshape(Ho * Wo, 1)

    kernel = functools.partial(_up_fused_kernel, oy0=oy0, ox0=ox0,
                               uy0=uy0, ux0=ux0, hh=hh, ww=ww)

    out_nhwc = pl.pallas_call(
        kernel,
        out_shape=jax.ShapeDtypeStruct((N, H2, W2, Cout), x2.dtype),
        grid_spec=pltpu.PrefetchScalarGridSpec(
            num_scalar_prefetch=0,
            grid=(N,),
            in_specs=[
                pl.BlockSpec((1, H1, W1, Cin), lambda n: (n, 0, 0, 0)),
                pl.BlockSpec((1, H2, W2, Cout), lambda n: (n, 0, 0, 0)),
                pl.BlockSpec((Cin, 4 * Cout), lambda n: (0, 0)),
                pl.BlockSpec((1, Cout), lambda n: (0, 0)),
                pl.BlockSpec((Ho * Wo, 1), lambda n: (0, 0)),
            ],
            out_specs=pl.BlockSpec((1, H2, W2, Cout), lambda n: (n, 0, 0, 0)),
        ),
        compiler_params=pltpu.CompilerParams(
            dimension_semantics=("parallel",),
        ),
    )(x1_nhwc, x2_nhwc, w_big, b2, ksel)

    return jnp.transpose(out_nhwc, (0, 3, 1, 2))                          # back to NCHW


def _reference(x1, x2, weight, bias):
    """Pure-JAX reference of up.forward (f32)."""
    N, Cin, H1, W1 = x1.shape
    Cout = weight.shape[1]
    # out[n, co, 2i+kh, 2j+kw] = sum_ci x1[n, ci, i, j] * w[ci, co, kh, kw] + b[co]
    t = jnp.einsum('ncij,cohw->noihjw', x1, weight)                 # (N, Cout, H1, 2, W1, 2)
    up = t.reshape(N, Cout, 2 * H1, 2 * W1) + bias.reshape(1, Cout, 1, 1)
    diffY = x2.shape[2] - up.shape[2]
    diffX = x2.shape[3] - up.shape[3]
    pt, pb = diffY // 2, diffY - diffY // 2
    pw0, pw1 = diffX // 2, diffX - diffX // 2
    up = jnp.pad(up, ((0, 0), (0, 0), (pt, pb), (pw0, pw1)))
    return x2 + up


if __name__ == "__main__":
    key = jax.random.PRNGKey(0)
    k1, k2, kwt, kb, k3 = jax.random.split(key, 5)

    N, Cin = 2, 4
    Cout = Cin // 2
    H1 = W1 = 8                                    # x1 spatial; upsampled -> 16x16

    bound = 1.0 / (Cin * 2 * 2) ** 0.5
    weight = jax.random.uniform(kwt, (Cin, Cout, 2, 2), jnp.float32, -bound, bound)
    bias = jax.random.uniform(kb, (Cout,), jnp.float32, -bound, bound)
    x1 = jax.random.normal(k1, (N, Cin, H1, W1), jnp.float32)

    # Case A: skip connection exactly matches upsampled size (diff = 0, fully fused store).
    x2a = jax.random.normal(k2, (N, Cout, 2 * H1, 2 * W1), jnp.float32)
    out_a = jax.block_until_ready(up_forward(x1, x2a, weight, bias))
    ref_a = _reference(x1, x2a, weight, bias)
    assert out_a.shape == x2a.shape
    assert jnp.allclose(out_a, ref_a, atol=5e-2, rtol=5e-2)

    # Case B: skip connection is larger along H (odd UNet sizes) -> exercises the F.pad path.
    x2b = jax.random.normal(k3, (N, Cout, 2 * H1 + 2, 2 * W1), jnp.float32)
    out_b = jax.block_until_ready(up_forward(x1, x2b, weight, bias))
    ref_b = _reference(x1, x2b, weight, bias)
    assert out_b.shape == x2b.shape
    assert jnp.allclose(out_b, ref_b, atol=5e-2, rtol=5e-2)

    print("KERNEL_OK")
</pallas_src>

<mosaic_0001>
module attributes {stable_mosaic.version = 11 : i64} {
  func.func @_up_fused_kernel(%arg0: i32, %arg1: memref<1x8x8x4xbf16, #tpu.memory_space<vmem>>, %arg2: memref<1x16x16x2xf32, #tpu.memory_space<vmem>>, %arg3: memref<4x8xbf16, #tpu.memory_space<vmem>>, %arg4: memref<1x2xf32, #tpu.memory_space<vmem>>, %arg5: memref<256x1xi32, #tpu.memory_space<vmem>>, %arg6: memref<1x16x16x2xf32, #tpu.memory_space<vmem>>) attributes {dimension_semantics = [#tpu.dimension_semantics<parallel>], iteration_bounds = array<i64: 2>, scalar_prefetch = 0 : i64, scratch_operands = 0 : i64, tpu.core_type = #tpu.core_type<tc>, window_params = [{transform_indices = @transform_0, window_bounds = array<i64: 1, 8, 8, 4>}, {transform_indices = @transform_1, window_bounds = array<i64: 1, 16, 16, 2>}, {pipeline_mode = #tpu.pipeline_mode<synchronous>, transform_indices = @transform_2, window_bounds = array<i64: 4, 8>}, {pipeline_mode = #tpu.pipeline_mode<synchronous>, transform_indices = @transform_3, window_bounds = array<i64: 1, 2>}, {pipeline_mode = #tpu.pipeline_mode<synchronous>, transform_indices = @transform_4, window_bounds = array<i64: 256, 1>}, {transform_indices = @transform_5, window_bounds = array<i64: 1, 16, 16, 2>}]} {
    %c0 = arith.constant 0 : index
    %c0_0 = arith.constant 0 : index
    %c0_1 = arith.constant 0 : index
    %c0_2 = arith.constant 0 : index
    %0 = vector.load %arg1[%c0, %c0_0, %c0_1, %c0_2] : memref<1x8x8x4xbf16, #tpu.memory_space<vmem>>, vector<1x8x8x4xbf16>
    %1 = vector.shape_cast %0 : vector<1x8x8x4xbf16> to vector<8x8x4xbf16>
    %2 = vector.shape_cast %1 : vector<8x8x4xbf16> to vector<8x1x8x4xbf16>
    %3 = vector.shape_cast %2 : vector<8x1x8x4xbf16> to vector<8x1x8x4xbf16>
    %4 = vector.broadcast %3 : vector<8x1x8x4xbf16> to vector<8x2x8x4xbf16>
    %5 = vector.shape_cast %4 : vector<8x2x8x4xbf16> to vector<16x8x4xbf16>
    %6 = vector.shape_cast %5 : vector<16x8x4xbf16> to vector<16x8x1x4xbf16>
    %7 = vector.shape_cast %6 : vector<16x8x1x4xbf16> to vector<16x8x1x4xbf16>
    %8 = vector.broadcast %7 : vector<16x8x1x4xbf16> to vector<16x8x2x4xbf16>
    %9 = vector.shape_cast %8 : vector<16x8x2x4xbf16> to vector<256x4xbf16>
    %c0_3 = arith.constant 0 : index
    %c0_4 = arith.constant 0 : index
    %10 = vector.load %arg3[%c0_3, %c0_4] : memref<4x8xbf16, #tpu.memory_space<vmem>>, vector<4x8xbf16>
    %cst = arith.constant dense<0.000000e+00> : vector<256x8xf32>
    %11 = tpu.matmul %9, %10, %cst {dimension_numbers = #tpu.dot_dimension_numbers<[1], [0], [0], [1], [0, 0, 1, 1], [], []>} : vector<256x4xbf16>, vector<4x8xbf16>, vector<256x8xf32> -> vector<256x8xf32>
    %c0_5 = arith.constant 0 : index
    %c0_6 = arith.constant 0 : index
    %12 = vector.load %arg5[%c0_5, %c0_6] : memref<256x1xi32, #tpu.memory_space<vmem>>, vector<256x1xi32>
    %13 = vector.extract_strided_slice %11 {offsets = [0, 0], sizes = [256, 2], strides = [1, 1]} : vector<256x8xf32> to vector<256x2xf32>
    %14 = vector.extract_strided_slice %11 {offsets = [0, 2], sizes = [256, 2], strides = [1, 1]} : vector<256x8xf32> to vector<256x2xf32>
    %15 = vector.extract_strided_slice %11 {offsets = [0, 4], sizes = [256, 2], strides = [1, 1]} : vector<256x8xf32> to vector<256x2xf32>
    %16 = vector.extract_strided_slice %11 {offsets = [0, 6], sizes = [256, 2], strides = [1, 1]} : vector<256x8xf32> to vector<256x2xf32>
    %c0_i32 = arith.constant 0 : i32
    %17 = vector.broadcast %c0_i32 : i32 to vector<256x1xi32>
    %18 = arith.cmpi eq, %12, %17 : vector<256x1xi32>
    %c1_i32 = arith.constant 1 : i32
    %19 = vector.broadcast %c1_i32 : i32 to vector<256x1xi32>
    %20 = arith.cmpi eq, %12, %19 : vector<256x1xi32>
    %c2_i32 = arith.constant 2 : i32
    %21 = vector.broadcast %c2_i32 : i32 to vector<256x1xi32>
    %22 = arith.cmpi eq, %12, %21 : vector<256x1xi32>
    %23 = vector.shape_cast %22 : vector<256x1xi1> to vector<256x1xi1>
    %24 = vector.broadcast %23 : vector<256x1xi1> to vector<256x2xi1>
    %25 = arith.select %24, %15, %16 : vector<256x2xi1>, vector<256x2xf32>
    %26 = vector.shape_cast %20 : vector<256x1xi1> to vector<256x1xi1>
    %27 = vector.broadcast %26 : vector<256x1xi1> to vector<256x2xi1>
    %28 = arith.select %27, %14, %25 : vector<256x2xi1>, vector<256x2xf32>
    %29 = vector.shape_cast %18 : vector<256x1xi1> to vector<256x1xi1>
    %30 = vector.broadcast %29 : vector<256x1xi1> to vector<256x2xi1>
    %31 = arith.select %30, %13, %28 : vector<256x2xi1>, vector<256x2xf32>
    %c0_7 = arith.constant 0 : index
    %c0_8 = arith.constant 0 : index
    %32 = vector.load %arg4[%c0_7, %c0_8] : memref<1x2xf32, #tpu.memory_space<vmem>>, vector<1x2xf32>
    %33 = vector.broadcast %32 : vector<1x2xf32> to vector<256x2xf32>
    %34 = arith.addf %31, %33 : vector<256x2xf32>
    %35 = vector.shape_cast %34 : vector<256x2xf32> to vector<16x16x2xf32>
    %c0_9 = arith.constant 0 : index
    %c0_10 = arith.constant 0 : index
    %c0_11 = arith.constant 0 : index
    %c0_12 = arith.constant 0 : index
    %36 = vector.load %arg2[%c0_9, %c0_10, %c0_11, %c0_12] : memref<1x16x16x2xf32, #tpu.memory_space<vmem>>, vector<1x16x16x2xf32>
    %37 = vector.shape_cast %36 : vector<1x16x16x2xf32> to vector<16x16x2xf32>
    %38 = arith.addf %37, %35 : vector<16x16x2xf32>
    %39 = vector.shape_cast %38 : vector<16x16x2xf32> to vector<1x16x16x2xf32>
    %c0_13 = arith.constant 0 : index
    %c0_14 = arith.constant 0 : index
    %c0_15 = arith.constant 0 : index
    %c0_16 = arith.constant 0 : index
    %40 = vector.load %arg6[%c0_13, %c0_14, %c0_15, %c0_16] : memref<1x16x16x2xf32, #tpu.memory_space<vmem>>, vector<1x16x16x2xf32>
    tpu.vector_store %arg6[%c0_13, %c0_14, %c0_15, %c0_16], %39 {strides = array<i32>} : memref<1x16x16x2xf32, #tpu.memory_space<vmem>>, vector<1x16x16x2xf32>,
    return
  }
  func.func @transform_0(%arg0: i32) -> (i32, i32, i32, i32) {
    %c0_i32 = arith.constant 0 : i32
    %c0_i32_0 = arith.constant 0 : i32
    %c0_i32_1 = arith.constant 0 : i32
    %c0_i32_2 = arith.constant 0 : i32
    return %arg0, %c0_i32, %c0_i32_0, %c0_i32_1 : i32, i32, i32, i32
  }
  func.func @transform_1(%arg0: i32) -> (i32, i32, i32, i32) {
    %c0_i32 = arith.constant 0 : i32
    %c0_i32_0 = arith.constant 0 : i32
    %c0_i32_1 = arith.constant 0 : i32
    %c0_i32_2 = arith.constant 0 : i32
    return %arg0, %c0_i32, %c0_i32_0, %c0_i32_1 : i32, i32, i32, i32
  }
  func.func @transform_2(%arg0: i32) -> (i32, i32) {
    %c0_i32 = arith.constant 0 : i32
    %c0_i32_0 = arith.constant 0 : i32
    %c0_i32_1 = arith.constant 0 : i32
    return %c0_i32, %c0_i32_0 : i32, i32
  }
  func.func @transform_3(%arg0: i32) -> (i32, i32) {
    %c0_i32 = arith.constant 0 : i32
    %c0_i32_0 = arith.constant 0 : i32
    %c0_i32_1 = arith.constant 0 : i32
    return %c0_i32, %c0_i32_0 : i32, i32
  }
  func.func @transform_4(%arg0: i32) -> (i32, i32) {
    %c0_i32 = arith.constant 0 : i32
    %c0_i32_0 = arith.constant 0 : i32
    %c0_i32_1 = arith.constant 0 : i32
    return %c0_i32, %c0_i32_0 : i32, i32
  }
  func.func @transform_5(%arg0: i32) -> (i32, i32, i32, i32) {
    %c0_i32 = arith.constant 0 : i32
    %c0_i32_0 = arith.constant 0 : i32
    %c0_i32_1 = arith.constant 0 : i32
    %c0_i32_2 = arith.constant 0 : i32
    return %arg0, %c0_i32, %c0_i32_0, %c0_i32_1 : i32, i32, i32, i32
  }
}

</mosaic_0001>

<bundles_post_ra>
// kernel: tpu_custom_call.1
= control target key start
LH: loop header
LB: loop body
LE: loop exit
PB: predicated region body
PF: predicated region fallthrough
CT: control target
= control target key end

     0   :  { %s3432_s18 = smov 0   ;;  %s4916_s0 = inlined_call_operand.vmem [shape: bf16[2,8,8,4], index: 0, kind: input, shape index: {}]   ;;  %s4917_s1 = inlined_call_operand.vmem [shape: f32[2,16,16,2], index: 1, kind: input, shape index: {}]   ;;  %s4918_s2 = inlined_call_operand.vmem [shape: bf16[4,8], index: 2, kind: input, shape index: {}]   ;;  %s4919_s3 = inlined_call_operand.vmem [shape: f32[1,2], index: 3, kind: input, shape index: {}]   ;;  %s4920_s4 = inlined_call_operand.vmem [shape: s32[256,1], index: 4, kind: input, shape index: {}]   ;;  %s4921_s5 = inlined_call_operand.vmem [shape: f32[2,16,16,2], index: 5, kind: output, shape index: {}]  }
   0x1 LB: > { %s3224_s19 = sadd.s32 4294967295, %s3397_s18   ;;  %p3228_p0 = scmp.ge.s32.totalorder %s3397_s18, 1  ;;  %s3397_s18 = sphi %s3432_s18, %s15_s18  }
   0x2   : > { %p197_p1 = scmp.lt.s32.totalorder %s3397_s18, 3 }
   0x4   : > { %p198_p2 = pnand %p3228_p0, %p197_p1 }
   0x6   : > { %201 = sbr.rel (%p198_p2) target bundleno = 716 (0x2cc), region = 40 }
   0xb   : > { %v3443_v0 = vld [vmem:[%s4920_s4 + $0x10] sm:$0xff]  ;;  %v3448_v1 = vld [vmem:[%s4920_s4] sm:$0xff]  ;;  %v3453_v2 = vld [vmem:[%s4920_s4 + $0x18] sm:$0xff]  ;;  %v3399_v3 = vmov 0   ;;  %vm1768_vm7 = vcmask 1041408   ;;  %p3510_p3 = scmp.lt.s32.totalorder %s3224_s19, 1  ;;  %v273_v20 = vlaneseq }
   0xc   : > { %3364 = vset.pattern.permute.xlu1 %v3399_v3  ;;  %3363 = vset.pattern.permute.xlu0 %v3399_v3  ;;  %vm2031_vm0 = vcmp.eq.s32.totalorder %v3443_v0, 2  ;;  %vm2029_vm1 = vcmp.eq.s32.totalorder %v3448_v1, 2  ;;  %vm2032_vm2 = vcmp.eq.s32.totalorder %v3453_v2, 2  ;;  %v3463_v4 = vld [vmem:[%s4920_s4 + $0x8] sm:$0xff]  ;;  %v3473_v6 = vld [vmem:[%s4920_s4 + $0x20] sm:$0xff]  ;;  %v3481_v9 = vld [vmem:[%s4920_s4 + $0x38] sm:$0xff] }
   0xd   : > { %v3468_v5 = vld [vmem:[%s4920_s4 + $0x28] sm:$0xff]  ;;  %v2063_v7 = vsel %vm2031_vm0, 1, %v3399_v3  ;;  %v2061_v8 = vsel %vm2029_vm1, 1, %v3399_v3  ;;  %vm2030_vm3 = vcmp.eq.s32.totalorder %v3463_v4, 2  ;;  %v3486_v10 = vld [vmem:[%s4920_s4 + $0x30] sm:$0xff]  ;;  %vm2033_vm5 = vcmp.eq.s32.totalorder %v3473_v6, 2 }
   0xe   : > { %2100 = vperm.xlu1 %3364, %v2063_v7   ;;  %2094 = vperm.xlu0 %3363, %v2061_v8   ;;  %vm2034_vm4 = vcmp.eq.s32.totalorder %v3468_v5, 2  ;;  %vm2036_vm6 = vcmp.eq.s32.totalorder %v3481_v9, 2  ;;  %v1942_v11 = vld [vmem:[%s4920_s4 + $0x48] sm:$0xff]  ;;  %v1941_v12 = vld [vmem:[%s4920_s4 + $0x40] sm:$0xff]  ;;  %v2064_v13 = vsel %vm2032_vm2, 1, %v3399_v3  ;;  %v2062_v14 = vsel %vm2030_vm3, 1, %v3399_v3 }
   0xf   : > { %vm2035_vm8 = vcmp.eq.s32.totalorder %v3486_v10, 2  ;;  %v1944_v15 = vld [vmem:[%s4920_s4 + $0x58] sm:$0xff]  ;;  %v1943_v16 = vld [vmem:[%s4920_s4 + $0x50] sm:$0xff]  ;;  %v2066_v17 = vsel %vm2034_vm4, 1, %v3399_v3  ;;  %vm2038_vm9 = vcmp.eq.s32.totalorder %v1942_v11, 2  ;;  %vm2037_vm10 = vcmp.eq.s32.totalorder %v1941_v12, 2 }
  0x10   : > { %v1946_v18 = vld [vmem:[%s4920_s4 + $0x68] sm:$0xff]  ;;  %v1945_v19 = vld [vmem:[%s4920_s4 + $0x60] sm:$0xff]  ;;  %v2065_v21 = vsel %vm2033_vm5, 1, %v3399_v3  ;;  %v2068_v22 = vsel %vm2036_vm6, 1, %v3399_v3  ;;  %vm2040_vm11 = vcmp.eq.s32.totalorder %v1944_v15, 2  ;;  %vm2039_vm12 = vcmp.eq.s32.totalorder %v1943_v16, 2 }
  0x11   : > { %v1286_v23 = vld [vmem:[%s4918_s2] sm:$0x3]  ;;  %v2067_v24 = vsel %vm2035_vm8, 1, %v3399_v3  ;;  %vm2042_vm13 = vcmp.eq.s32.totalorder %v1946_v18, 2  ;;  %vm2041_vm14 = vcmp.eq.s32.totalorder %v1945_v19, 2  ;;  %v1948_v25 = vld [vmem:[%s4920_s4 + $0x78] sm:$0xff] }
  0x12   : > { %2103 = vperm.xlu1 %3364, %v2064_v13   ;;  %2097 = vperm.xlu0 %3363, %v2062_v14   ;;  %v1947_v26 = vld [vmem:[%s4920_s4 + $0x70] sm:$0xff]  ;;  %v1770_v27 = vsel %vm1768_vm7, %v1286_v23, 0  ;;  %v2070_v28 = vsel %vm2038_vm9, 1, %v3399_v3  ;;  %v2069_v29 = vsel %vm2037_vm10, 1, %v3399_v3  ;;  %vm2044_vm15 = vcmp.eq.s32.totalorder %v1948_v25, 2  ;;  %s5072_s19 = smov (!%p3510_p3, %s3224_s19), 1 }
  0x13   : > { %3350 = vmatprep.subr.msk.bf16.mxu0 %vm1768_vm7, %v1286_v23  ;;  %3351 = vmatprep.subr.msk.bf16.mxu1 %vm1768_vm7, %v1286_v23  ;;  %vm2043_vm0 = vcmp.eq.s32.totalorder %v1947_v26, 2  ;;  %v1950_v30 = vld [vmem:[%s4920_s4 + $0x88] sm:$0xff]  ;;  %v3557_v31 = vsel %vm2040_vm11, 1, %v3399_v3  ;;  %v3561_v32 = vsel %vm2039_vm12, 1, %v3399_v3  ;;  %v274_v33 = vshrl.u32 %v273_v20, 7  ;;  %v1949_v34 = vld [vmem:[%s4920_s4 + $0x80] sm:$0xff] }
  0x14   : > { %3315 = vmatpush3.bf16.msra.mxu0 %v1770_v27  ;;  %3349 = vmatpush3.bf16.msra.mxu1 %v1770_v27  ;;  %v3568_v35 = vsel %vm2042_vm13, 1, %v3399_v3  ;;  %v3572_v36 = vsel %vm2041_vm14, 1, %v3399_v3  ;;  %s3294_s11 = sshll.u32 %s5072_s19, 5  ;;  %v3400_v37 = vmov 1966171168   ;;  %vm2046_vm1 = vcmp.eq.s32.totalorder %v1950_v30, 2 }
  0x15   : > { %v271_v38 = vunpack.c.l.s4 %v3400_v37  ;;  %v1952_v39 = vld [vmem:[%s4920_s4 + $0x98] sm:$0xff]  ;;  %v3580_v40 = vsel %vm2044_vm15, 1, %v3399_v3  ;;  %v3584_v41 = vsel %vm2043_vm0, 1, %v3399_v3  ;;  %s3589_s16 = scalar_lea.vmem %s4916_s0, %s3294_s11  ;;  %v3591_v42 = vsub.s32 0, %v274_v33  ;;  %v1951_v43 = vld [vmem:[%s4920_s4 + $0x90] sm:$0xff]  ;;  %v1954_v44 = vld [vmem:[%s4920_s4 + $0xa8] sm:$0xff] }
  0x16   : > { %2109 = vperm.xlu1 %3364, %v2066_v17   ;;  %2106 = vperm.xlu0 %3363, %v2065_v21   ;;  %vm2045_vm2 = vcmp.eq.s32.totalorder %v1949_v34, 2  ;;  %v3235_v45 = vld.sshfl [vmem:[%s3589_s16] sm:$0x33 pattern:$0x75316420]  ;;  %vm2048_vm3 = vcmp.eq.s32.totalorder %v1952_v39, 2 }
  0x17   : > { %v272_v46 = vunpack.c.0.s8 %v271_v38  ;;  %vm2047_vm4 = vcmp.eq.s32.totalorder %v1951_v43, 2  ;;  %v269_v47 = vcombine.high %v3235_v45, %v3235_v45  ;;  %v3239_v48 = vld.sshfl [vmem:[%s3589_s16 + $0x10] sm:$0x33 pattern:$0x75316420]  ;;  %v3603_v49 = vsel %vm2046_vm1, 1, %v3399_v3 }
  0x18   : > { %vm2050_vm5 = vcmp.eq.s32.totalorder %v1954_v44, 2  ;;  %v365_v51 = vcombine.high %v3239_v48, %v3239_v48  ;;  %v3608_v52 = vsel %vm2045_vm2, 1, %v3399_v3  ;;  %v1953_v53 = vld [vmem:[%s4920_s4 + $0xa0] sm:$0xff]  ;;  %v3615_v55 = vsel %vm2048_vm3, 1, %v3399_v3  ;;  %s3401_s28 = smov 126   ;;  %s3295_s29 = sshll.u32 %s5072_s19, 8 }
  0x19   : > { %v3605_v50 = vsub.s32 %v272_v46, %v274_v33  ;;  %v3236_v54 = vld.sshfl [vmem:[%s3589_s16 + $0x4] sm:$0x33 pattern:$0x75316420]  ;;  %v3618_v56 = vsel %vm2047_vm4, 1, %v3399_v3  ;;  %vm2049_vm6 = vcmp.eq.s32.totalorder %v1953_v53, 2  ;;  %s4709_s7 = scalar_lea.vmem %s4917_s1, %s3295_s29  ;;  %s4728_s11 = scalar_lea.vmem %s4921_s5, %s3295_s29 }
  0x1a   : > { %2115 = vperm.xlu1 %3364, %v2068_v22   ;;  %2112 = vperm.xlu0 %3363, %v2067_v24   ;;  %v293_v57 = vcombine.high %v3236_v54, %v3236_v54  ;;  %v3626_v61 = vsel %vm2050_vm5, 1, %v3399_v3  ;;  %v3632_v63 = vsel %vm2049_vm6, 1, %v3399_v3  ;;  %vm1743_vm7 = vcmask 31744  }
  0x1b   : > { %v276_v58 = vrot.slane %v3235_v45, %v3605_v50  ;;  %v283_v59 = vrot.slane %v269_v47, %v3605_v50  ;;  %v3623_v60 = vrot.slane %v3239_v48, %v3605_v50  ;;  %v3629_v62 = vrot.slane %v365_v51, %v3605_v50 }
  0x1c   : > { %v3635_v7 = vrot.slane %v3236_v54, %v3605_v50  ;;  %v3638_v8 = vrot.slane %v293_v57, %v3605_v50  ;;  %vm1998_vm2 = vcmp.eq.s32.totalorder %v3463_v4, 1  ;;  %vm1997_vm3 = vcmp.eq.s32.totalorder %v3448_v1, 1 }
  0x1d   : > { %v284_v11 = vcombine.high %v276_v58, %v276_v58  ;;  %v285_v12 = vcombine.high %v283_v59, %v283_v59  ;;  %v455_v13 = vunpack.i.h.s16 %v276_v58  ;;  %v457_v14 = vunpack.i.h.s16 %v283_v59 }
  0x1e   : > { %2121 = vperm.xlu1 %3364, %v2070_v28   ;;  %2118 = vperm.xlu0 %3363, %v2069_v29   ;;  %v3243_v15 = vpack.i.b16 %v276_v58, %v276_v58  ;;  %v3244_v16 = vpack.i.b16 %v283_v59, %v283_v59  ;;  %v3642_v17 = vcombine.high %v3623_v60, %v3623_v60  ;;  %v487_v18 = vunpack.i.h.s16 %v3623_v60 }
  0x1f   : > { %v459_v19 = vunpack.i.h.s16 %v284_v11  ;;  %v461_v20 = vunpack.i.h.s16 %v285_v12  ;;  %v519_v21 = vpack.i.b16 %v455_v13, %v455_v13  ;;  %v521_v22 = vpack.i.b16 %v457_v14, %v457_v14 }
  0x20   : > { %v3245_v23 = vpack.i.b16 %v284_v11, %v284_v11  ;;  %v3246_v24 = vpack.i.b16 %v285_v12, %v285_v12  ;;  %v585_v25 = vrot.slane %v3243_v15, %v3591_v42  ;;  %v593_v26 = vrot.slane %v3244_v16, %v3591_v42 }
  0x21   : > { %v523_v27 = vpack.i.b16 %v459_v19, %v459_v19  ;;  %v525_v28 = vpack.i.b16 %v461_v20, %v461_v20  ;;  %v589_v29 = vrot.slane %v519_v21, %v3591_v42  ;;  %v597_v30 = vrot.slane %v521_v22, %v3591_v42 }
  0x22   : > { %2127 = vperm.xlu1 %3364, %v3557_v31   ;;  %2124 = vperm.xlu0 %3363, %v3561_v32   ;;  %v601_v33 = vrot.slane %v3245_v23, %v3591_v42  ;;  %v609_v34 = vrot.slane %v3246_v24, %v3591_v42  ;;  %v839_v37 = vpack.i.b16 %v585_v25, %v585_v25  ;;  %v489_v38 = vunpack.i.h.s16 %v3629_v62 }
  0x23   : > { %v605_v39 = vrot.slane %v523_v27, %v3591_v42  ;;  %v613_v43 = vrot.slane %v525_v28, %v3591_v42  ;;  %v846_v44 = vpack.i.b16 %v589_v29, %v589_v29  ;;  %v853_v45 = vpack.i.b16 %v593_v26, %v593_v26 }
  0x24   : > { %v844_v46 = vrot.slane %v839_v37, %v3591_v42  ;;  %v860_v47 = vpack.i.b16 %v597_v30, %v597_v30  ;;  %v867_v48 = vpack.i.b16 %v601_v33, %v601_v33  ;;  %v881_v31 = vpack.i.b16 %v609_v34, %v609_v34 }
  0x25   : > { %v851_v32 = vrot.slane %v846_v44, %v3591_v42  ;;  %v858_v51 = vrot.slane %v853_v45, %v3591_v42  ;;  %v874_v53 = vpack.i.b16 %v605_v39, %v605_v39  ;;  %v888_v54 = vpack.i.b16 %v613_v43, %v613_v43 }
  0x26   : > { %2133 = vperm.xlu1 %3364, %v3568_v35   ;;  %2130 = vperm.xlu0 %3363, %v3572_v36   ;;  %v865_v57 = vrot.slane %v860_v47, %v3591_v42  ;;  %v872_v58 = vrot.slane %v867_v48, %v3591_v42  ;;  %v886_v59 = vrot.slane %v881_v31, %v3591_v42  ;;  %v491_v11 = vunpack.i.h.s16 %v3642_v17 }
  0x27   : > { %v879_v12 = vrot.slane %v874_v53, %v3591_v42  ;;  %v893_v13 = vrot.slane %v888_v54, %v3591_v42  ;;  %v1351_v14 = vcombine.low %v844_v46, %v851_v32  ;;  %v381_v15 = vcombine.high %v3629_v62, %v3629_v62 }
  0x28   : > { %v1352_v16 = vcombine.low %v858_v51, %v865_v57  ;;  %v3259_v35 = vpack.i.b16 %v3623_v60, %v3623_v60  ;;  %v551_v36 = vpack.i.b16 %v487_v18, %v487_v18  ;;  %v3260_v19 = vpack.i.b16 %v3629_v62, %v3629_v62 }
  0x29   : > { %v1353_v20 = vcombine.low %v872_v58, %v879_v12  ;;  %v1354_v21 = vcombine.low %v886_v59, %v893_v13  ;;  %v1361_v22 = vrot.slane %v1351_v14, %v3605_v50  ;;  %v493_v23 = vunpack.i.h.s16 %v381_v15 }
  0x2a   : > { %2139 = vperm.xlu1 %3364, %v3580_v40   ;;  %2136 = vperm.xlu0 %3363, %v3584_v41   ;;  %v1368_v24 = vrot.slane %v1352_v16, %v3605_v50  ;;  %v553_v25 = vpack.i.b16 %v489_v38, %v489_v38  ;;  %v3261_v26 = vpack.i.b16 %v3642_v17, %v3642_v17  ;;  %v463_v60 = vunpack.i.h.s16 %v3635_v7 }
  0x2b   : > { %v1375_v18 = vrot.slane %v1353_v20, %v3605_v50  ;;  %v1382_v62 = vrot.slane %v1354_v21, %v3605_v50  ;;  %v555_v27 = vpack.i.b16 %v491_v11, %v491_v11  ;;  %v3262_v28 = vpack.i.b16 %v381_v15, %v381_v15 }
  0x2c   : > { %v1383_v29 = vcombine.low %v1361_v22, %v1368_v24  ;;  %v557_v30 = vpack.i.b16 %v493_v23, %v493_v23  ;;  %v713_v40 = vrot.slane %v3259_v35, %v3591_v42  ;;  %v717_v41 = vrot.slane %v551_v36, %v3591_v42 }
  0x2d   : > { %v1384_v33 = vcombine.low %v1375_v18, %v1382_v62  ;;  %v721_v34 = vrot.slane %v3260_v19, %v3591_v42  ;;  %v725_v37 = vrot.slane %v553_v25, %v3591_v42  ;;  %v729_v17 = vrot.slane %v3261_v26, %v3591_v42 }
  0x2e   : > { %v1391_v38 = vrot.slane %v1383_v29, %v3605_v50  ;;  %v733_v39 = vrot.slane %v555_v27, %v3591_v42  ;;  %v737_v43 = vrot.slane %v3262_v28, %v3591_v42  ;;  %v741_v44 = vrot.slane %v557_v30, %v3591_v42  ;;  %2145 = vperm.xlu1 %3364, %v3603_v49  }
  0x2f   : > { %v1398_v45 = vrot.slane %v1384_v33, %v3605_v50  ;;  %v1063_v46 = vpack.i.b16 %v713_v40, %v713_v40  ;;  %v1070_v47 = vpack.i.b16 %v717_v41, %v717_v41  ;;  %v1077_v48 = vpack.i.b16 %v721_v34, %v721_v34  ;;  %2142 = vperm.xlu0 %3363, %v3608_v52   ;;  %v3705_v52 = vld [vmem:[%s4920_s4 + $0xb8] sm:$0xff] }
  0x30   : > { %v1084_v31 = vpack.i.b16 %v725_v37, %v725_v37  ;;  %v1091_v32 = vpack.i.b16 %v729_v17, %v729_v17  ;;  %v1098_v51 = vpack.i.b16 %v733_v39, %v733_v39  ;;  %v1105_v53 = vpack.i.b16 %v737_v43, %v737_v43 }
  0x31   : > { %v1399_v54 = vcombine.low %v1391_v38, %v1398_v45  ;;  %v1068_v57 = vrot.slane %v1063_v46, %v3591_v42  ;;  %v1075_v58 = vrot.slane %v1070_v47, %v3591_v42  ;;  %v1082_v59 = vrot.slane %v1077_v48, %v3591_v42 }
  0x32   : > { %v1089_v49 = vrot.slane %v1084_v31, %v3591_v42  ;;  %v1096_v11 = vrot.slane %v1091_v32, %v3591_v42  ;;  %v1103_v12 = vrot.slane %v1098_v51, %v3591_v42  ;;  %v1110_v13 = vrot.slane %v1105_v53, %v3591_v42  ;;  %2151 = vperm.xlu1 %3364, %v3615_v55  }
  0x33   : > { %3316 = vmatprep.mubr.msk.bf16.mxu0 %vm1743_vm7, %v1399_v54  ;;  %v1112_v14 = vpack.i.b16 %v741_v44, %v741_v44  ;;  %v1547_v15 = vcombine.low %v1068_v57, %v1075_v58  ;;  %2148 = vperm.xlu0 %3363, %v3618_v56   ;;  %v308_v16 = vcombine.high %v3635_v7, %v3635_v7  ;;  %v465_v35 = vunpack.i.h.s16 %v3638_v8 }
  0x34   : > { %v1548_v36 = vcombine.low %v1082_v59, %v1089_v49  ;;  %v1549_v19 = vcombine.low %v1096_v11, %v1103_v12  ;;  %3317 = vmatmul.mubr.msk.bf16.vlgmr.msra.gmra.mxu0 %vm1743_vm7, %v1399_v54  ;;  %v309_v55 = vcombine.high %v3638_v8, %v3638_v8  ;;  %v3247_v20 = vpack.i.b16 %v3635_v7, %v3635_v7  ;;  %v3742_v54 = vld [vmem:[%s4920_s4 + $0xb0] sm:$0xff] }
  0x35   : > { %v1117_v21 = vrot.slane %v1112_v14, %v3591_v42  ;;  %v1557_v22 = vrot.slane %v1547_v15, %v3605_v50  ;;  %v467_v56 = vunpack.i.h.s16 %v308_v16  ;;  %v527_v23 = vpack.i.b16 %v463_v60, %v463_v60  ;;  %v3240_v11 = vld.sshfl [vmem:[%s3589_s16 + $0x14] sm:$0x33 pattern:$0x75316420] }
  0x36   : > { %vm2052_vm8 = vcmp.eq.s32.totalorder %v3705_v52, 2  ;;  %v1564_v24 = vrot.slane %v1548_v36, %v3605_v50  ;;  %v1571_v25 = vrot.slane %v1549_v19, %v3605_v50  ;;  %2157 = vperm.xlu1 %3364, %v3626_v61   ;;  %v469_v26 = vunpack.i.h.s16 %v309_v55 }
  0x37   : > { %v3248_v18 = vpack.i.b16 %v3638_v8, %v3638_v8  ;;  %v1550_v62 = vcombine.low %v1110_v13, %v1117_v21  ;;  %2154 = vperm.xlu0 %3363, %v3632_v63   ;;  %v529_v7 = vpack.i.b16 %v465_v35, %v465_v35  ;;  %v3249_v27 = vpack.i.b16 %v308_v16, %v308_v16  ;;  %v3753_v16 = vld [vmem:[%s4920_s4 + $0xc8] sm:$0xff] }
  0x38   : > { %v531_v28 = vpack.i.b16 %v467_v56, %v467_v56  ;;  %v1579_v29 = vcombine.low %v1557_v22, %v1564_v24  ;;  %v3250_v60 = vpack.i.b16 %v309_v55, %v309_v55  ;;  %v533_v30 = vpack.i.b16 %v469_v26, %v469_v26  ;;  %v3762_v55 = vld [vmem:[%s4920_s4 + $0xc0] sm:$0xff] }
  0x39   : > { %v617_v40 = vrot.slane %v3247_v20, %v3591_v42  ;;  %v1578_v41 = vrot.slane %v1550_v62, %v3605_v50  ;;  %v621_v33 = vrot.slane %v527_v23, %v3591_v42  ;;  %v625_v61 = vrot.slane %v3248_v18, %v3591_v42 }
  0x3a   : > { %v629_v34 = vrot.slane %v529_v7, %v3591_v42  ;;  %v1587_v8 = vrot.slane %v1579_v29, %v3605_v50  ;;  %v633_v63 = vrot.slane %v3249_v27, %v3591_v42  ;;  %v637_v37 = vrot.slane %v531_v28, %v3591_v42 }
  0x3b   : > { %v641_v17 = vrot.slane %v3250_v60, %v3591_v42  ;;  %v1580_v38 = vcombine.low %v1571_v25, %v1578_v41  ;;  %v645_v39 = vrot.slane %v533_v30, %v3591_v42  ;;  %v895_v43 = vpack.i.b16 %v617_v40, %v617_v40 }
  0x3c   : > { %v902_v44 = vpack.i.b16 %v621_v33, %v621_v33  ;;  %v909_v45 = vpack.i.b16 %v625_v61, %v625_v61  ;;  %v916_v46 = vpack.i.b16 %v629_v34, %v629_v34  ;;  %v923_v47 = vpack.i.b16 %v633_v63, %v633_v63 }
  0x3d   : > { %v930_v48 = vpack.i.b16 %v637_v37, %v637_v37  ;;  %v1594_v31 = vrot.slane %v1580_v38, %v3605_v50  ;;  %v900_v32 = vrot.slane %v895_v43, %v3591_v42  ;;  %v937_v53 = vpack.i.b16 %v641_v17, %v641_v17 }
  0x3e   : > { %v907_v51 = vrot.slane %v902_v44, %v3591_v42  ;;  %v914_v57 = vrot.slane %v909_v45, %v3591_v42  ;;  %v921_v58 = vrot.slane %v916_v46, %v3591_v42  ;;  %v928_v59 = vrot.slane %v923_v47, %v3591_v42 }
  0x3f   : > { %v935_v49 = vrot.slane %v930_v48, %v3591_v42  ;;  %v1595_v12 = vcombine.low %v1587_v8, %v1594_v31  ;;  %v942_v13 = vrot.slane %v937_v53, %v3591_v42  ;;  %v944_v14 = vpack.i.b16 %v645_v39, %v645_v39 }
  0x40   : > { %v1400_v15 = vcombine.low %v900_v32, %v907_v51  ;;  %v1401_v35 = vcombine.low %v914_v57, %v921_v58  ;;  %v2084_v19 = vsel %vm2052_vm8, 1, %v3399_v3  ;;  %vm2051_vm9 = vcmp.eq.s32.totalorder %v3742_v54, 2 }
  0x41   : > { %v1402_v36 = vcombine.low %v928_v59, %v935_v49  ;;  %3332 = vmatprep.mubr.msk.bf16.mxu1 %vm1743_vm7, %v1595_v12  ;;  %v949_v20 = vrot.slane %v944_v14, %v3591_v42  ;;  %2163 = vperm.xlu1 %3364, %v2084_v19   ;;  %v2083_v22 = vsel %vm2051_vm9, 1, %v3399_v3  ;;  %v389_v56 = vcombine.high %v3240_v11, %v3240_v11 }
  0x42   : > { %v1410_v21 = vrot.slane %v1400_v15, %v3605_v50  ;;  %3333 = vmatmul.mubr.msk.bf16.vlgmr.msra.gmra.mxu1 %vm1743_vm7, %v1595_v12  ;;  %v1417_v23 = vrot.slane %v1401_v35, %v3605_v50  ;;  %2160 = vperm.xlu0 %3363, %v2083_v22   ;;  %v396_v25 = vrot.slane %v3240_v11, %v3605_v50  ;;  %vm2054_vm10 = vcmp.eq.s32.totalorder %v3753_v16, 2  ;;  %v3792_v35 = vld [vmem:[%s4920_s4 + $0xd8] sm:$0xff]  ;;  %v3800_v22 = vld [vmem:[%s4920_s4 + $0xd0] sm:$0xff] }
  0x43   : > { %v1424_v24 = vrot.slane %v1402_v36, %v3605_v50  ;;  %v1403_v26 = vcombine.low %v942_v13, %v949_v20  ;;  %v403_v18 = vrot.slane %v389_v56, %v3605_v50  ;;  %v2086_v62 = vsel %vm2054_vm10, 1, %v3399_v3 }
  0x44   : > { %vm2053_vm11 = vcmp.eq.s32.totalorder %v3762_v55, 2  ;;  %v1432_v7 = vcombine.low %v1410_v21, %v1417_v23  ;;  %v404_v27 = vcombine.high %v396_v25, %v396_v25  ;;  %v495_v28 = vunpack.i.h.s16 %v396_v25 }
  0x45   : > { %v3263_v29 = vpack.i.b16 %v396_v25, %v396_v25  ;;  %v1431_v60 = vrot.slane %v1403_v26, %v3605_v50  ;;  %v405_v30 = vcombine.high %v403_v18, %v403_v18  ;;  %v497_v40 = vunpack.i.h.s16 %v403_v18  ;;  %2169 = vperm.xlu1 %3364, %v2086_v62   ;;  %v3811_v26 = vld [vmem:[%s4920_s4 + $0xe8] sm:$0xff] }
  0x46   : > { %v3264_v41 = vpack.i.b16 %v403_v18, %v403_v18  ;;  %v1440_v33 = vrot.slane %v1432_v7, %v3605_v50  ;;  %v499_v61 = vunpack.i.h.s16 %v404_v27  ;;  %v559_v34 = vpack.i.b16 %v495_v28, %v495_v28  ;;  %v3237_v28 = vld.sshfl [vmem:[%s3589_s16 + $0x8] sm:$0x33 pattern:$0x75316420] }
  0x47   : > { %v3265_v8 = vpack.i.b16 %v404_v27, %v404_v27  ;;  %v1433_v63 = vcombine.low %v1424_v24, %v1431_v60  ;;  %v501_v37 = vunpack.i.h.s16 %v405_v30  ;;  %v561_v17 = vpack.i.b16 %v497_v40, %v497_v40  ;;  %v3819_v27 = vld [vmem:[%s4920_s4 + $0xe0] sm:$0xff]  ;;  %v3828_v40 = vld [vmem:[%s4920_s4 + $0xf8] sm:$0xff] }
  0x48   : > { %v3266_v38 = vpack.i.b16 %v405_v30, %v405_v30  ;;  %v563_v39 = vpack.i.b16 %v499_v61, %v499_v61  ;;  %v745_v43 = vrot.slane %v3263_v29, %v3591_v42  ;;  %v749_v44 = vrot.slane %v559_v34, %v3591_v42 }
  0x49   : > { %v753_v45 = vrot.slane %v3264_v41, %v3591_v42  ;;  %v1447_v46 = vrot.slane %v1433_v63, %v3605_v50  ;;  %v565_v47 = vpack.i.b16 %v501_v37, %v501_v37  ;;  %v757_v48 = vrot.slane %v561_v17, %v3591_v42  ;;  %v3833_v41 = vld [vmem:[%s4920_s4 + $0xf0] sm:$0xff] }
  0x4a   : > { %v761_v31 = vrot.slane %v3265_v8, %v3591_v42  ;;  %v765_v32 = vrot.slane %v563_v39, %v3591_v42  ;;  %v769_v51 = vrot.slane %v3266_v38, %v3591_v42  ;;  %v1119_v53 = vpack.i.b16 %v745_v43, %v745_v43  ;;  %v3839_v8 = vld.sshfl [vmem:[%s3589_s16 + $0x18] sm:$0x33 pattern:$0x75316420] }
  0x4b   : > { %v1126_v57 = vpack.i.b16 %v749_v44, %v749_v44  ;;  %v1448_v58 = vcombine.low %v1440_v33, %v1447_v46  ;;  %v773_v59 = vrot.slane %v565_v47, %v3591_v42  ;;  %v1133_v49 = vpack.i.b16 %v753_v45, %v753_v45 }
  0x4c   : > { %v1140_v11 = vpack.i.b16 %v757_v48, %v757_v48  ;;  %v1124_v12 = vrot.slane %v1119_v53, %v3591_v42  ;;  %v1147_v14 = vpack.i.b16 %v761_v31, %v761_v31  ;;  %v1154_v15 = vpack.i.b16 %v765_v32, %v765_v32 }
  0x4d   : > { %v1131_v13 = vrot.slane %v1126_v57, %v3591_v42  ;;  %3320 = vmatprep.mubr.msk.bf16.mxu0 %vm1743_vm7, %v1448_v58  ;;  %v1138_v36 = vrot.slane %v1133_v49, %v3591_v42  ;;  %v1161_v20 = vpack.i.b16 %v769_v51, %v769_v51  ;;  %v1168_v21 = vpack.i.b16 %v773_v59, %v773_v59 }
  0x4e   : > { %v1145_v19 = vrot.slane %v1140_v11, %v3591_v42  ;;  %3321 = vmatmul.mubr.msk.bf16.gmra.mxu0 %vm1743_vm7, %v1448_v58  ;;  %v1152_v56 = vrot.slane %v1147_v14, %v3591_v42  ;;  %v1159_v23 = vrot.slane %v1154_v15, %v3591_v42  ;;  %v2085_v25 = vsel %vm2053_vm11, 1, %v3399_v3 }
  0x4f   : > { %v1596_v24 = vcombine.low %v1124_v12, %v1131_v13  ;;  %v1166_v18 = vrot.slane %v1161_v20, %v3591_v42  ;;  %v1173_v62 = vrot.slane %v1168_v21, %v3591_v42  ;;  %2166 = vperm.xlu0 %3363, %v2085_v25   ;;  %vm2056_vm12 = vcmp.eq.s32.totalorder %v3792_v35, 2 }
  0x50   : > { %v1597_v7 = vcombine.low %v1138_v36, %v1145_v19  ;;  %v1598_v29 = vcombine.low %v1152_v56, %v1159_v23  ;;  %v2088_v30 = vsel %vm2056_vm12, 1, %v3399_v3  ;;  %vm2055_vm13 = vcmp.eq.s32.totalorder %v3800_v22, 2 }
  0x51   : > { %v1606_v60 = vrot.slane %v1596_v24, %v3605_v50  ;;  %v1599_v33 = vcombine.low %v1166_v18, %v1173_v62  ;;  %2175 = vperm.xlu1 %3364, %v2088_v30   ;;  %v2087_v34 = vsel %vm2055_vm13, 1, %v3399_v3  ;;  %vm2058_vm14 = vcmp.eq.s32.totalorder %v3811_v26, 2 }
  0x52   : > { %v1613_v61 = vrot.slane %v1597_v7, %v3605_v50  ;;  %v1620_v63 = vrot.slane %v1598_v29, %v3605_v50  ;;  %v2090_v37 = vsel %vm2058_vm14, 1, %v3399_v3  ;;  %vm2057_vm15 = vcmp.eq.s32.totalorder %v3819_v27, 2 }
  0x53   : > { %v317_v17 = vcombine.high %v3237_v28, %v3237_v28  ;;  %v1627_v38 = vrot.slane %v1599_v33, %v3605_v50  ;;  %2172 = vperm.xlu0 %3363, %v2087_v34   ;;  %v2089_v43 = vsel %vm2057_vm15, 1, %v3399_v3  ;;  %v324_v44 = vrot.slane %v3237_v28, %v3605_v50 }
  0x54   : > { %v1628_v39 = vcombine.low %v1606_v60, %v1613_v61  ;;  %vm2060_vm0 = vcmp.eq.s32.totalorder %v3828_v40, 2  ;;  %vm2059_vm1 = vcmp.eq.s32.totalorder %v3833_v41, 2  ;;  %v413_v46 = vcombine.high %v3839_v8, %v3839_v8 }
  0x55   : > { %v331_v45 = vrot.slane %v317_v17, %v3605_v50  ;;  %v1629_v47 = vcombine.low %v1620_v63, %v1627_v38  ;;  %2181 = vperm.xlu1 %3364, %v2090_v37   ;;  %v332_v31 = vcombine.high %v324_v44, %v324_v44  ;;  %v471_v32 = vunpack.i.h.s16 %v324_v44 }
  0x56   : > { %v1636_v48 = vrot.slane %v1628_v39, %v3605_v50  ;;  %v3251_v57 = vpack.i.b16 %v324_v44, %v324_v44  ;;  %vm2000_vm4 = vcmp.eq.s32.totalorder %v3453_v2, 1  ;;  %vm1999_vm5 = vcmp.eq.s32.totalorder %v3443_v0, 1 }
  0x57   : > { %v333_v51 = vcombine.high %v331_v45, %v331_v45  ;;  %v473_v53 = vunpack.i.h.s16 %v331_v45  ;;  %v3252_v58 = vpack.i.b16 %v331_v45, %v331_v45  ;;  %v1643_v59 = vrot.slane %v1629_v47, %v3605_v50  ;;  %2178 = vperm.xlu0 %3363, %v2089_v43  }
  0x58   : > { %v475_v49 = vunpack.i.h.s16 %v332_v31  ;;  %v535_v11 = vpack.i.b16 %v471_v32, %v471_v32  ;;  %v3253_v12 = vpack.i.b16 %v332_v31, %v332_v31  ;;  %v649_v36 = vrot.slane %v3251_v57, %v3591_v42 }
  0x59   : > { %v477_v13 = vunpack.i.h.s16 %v333_v51  ;;  %v537_v14 = vpack.i.b16 %v473_v53, %v473_v53  ;;  %v3254_v15 = vpack.i.b16 %v333_v51, %v333_v51  ;;  %v1644_v19 = vcombine.low %v1636_v48, %v1643_v59 }
  0x5a   : > { %v539_v20 = vpack.i.b16 %v475_v49, %v475_v49  ;;  %v653_v21 = vrot.slane %v535_v11, %v3591_v42  ;;  %v657_v56 = vrot.slane %v3252_v58, %v3591_v42  ;;  %v665_v25 = vrot.slane %v3253_v12, %v3591_v42 }
  0x5b   : > { %v541_v23 = vpack.i.b16 %v477_v13, %v477_v13  ;;  %v661_v24 = vrot.slane %v537_v14, %v3591_v42  ;;  %v673_v18 = vrot.slane %v3254_v15, %v3591_v42  ;;  %3336 = vmatprep.mubr.msk.bf16.mxu1 %vm1743_vm7, %v1644_v19  ;;  %v951_v7 = vpack.i.b16 %v649_v36, %v649_v36 }
  0x5c   : > { %v669_v62 = vrot.slane %v539_v20, %v3591_v42  ;;  %v958_v28 = vpack.i.b16 %v653_v21, %v653_v21  ;;  %v965_v29 = vpack.i.b16 %v657_v56, %v657_v56  ;;  %3337 = vmatmul.mubr.msk.bf16.gmra.mxu1 %vm1743_vm7, %v1644_v19  ;;  %v979_v33 = vpack.i.b16 %v665_v25, %v665_v25 }
  0x5d   : > { %v677_v60 = vrot.slane %v541_v23, %v3591_v42  ;;  %v972_v30 = vpack.i.b16 %v661_v24, %v661_v24  ;;  %v993_v61 = vpack.i.b16 %v673_v18, %v673_v18  ;;  %v956_v34 = vrot.slane %v951_v7, %v3591_v42 }
  0x5e   : > { %v963_v63 = vrot.slane %v958_v28, %v3591_v42  ;;  %v970_v37 = vrot.slane %v965_v29, %v3591_v42  ;;  %v986_v17 = vpack.i.b16 %v669_v62, %v669_v62  ;;  %v984_v39 = vrot.slane %v979_v33, %v3591_v42 }
  0x5f   : > { %v977_v38 = vrot.slane %v972_v30, %v3591_v42  ;;  %v998_v43 = vrot.slane %v993_v61, %v3591_v42  ;;  %v1000_v44 = vpack.i.b16 %v677_v60, %v677_v60  ;;  %v2092_v48 = vsel %vm2060_vm0, 1, %v3399_v3 }
  0x60   : > { %v991_v45 = vrot.slane %v986_v17, %v3591_v42  ;;  %v1449_v47 = vcombine.low %v956_v34, %v963_v63  ;;  %v2091_v31 = vsel %vm2059_vm1, 1, %v3399_v3  ;;  %2187 = vperm.xlu1 %3364, %v2092_v48   ;;  %v420_v53 = vrot.slane %v3839_v8, %v3605_v50 }
  0x61   : > { %v1005_v32 = vrot.slane %v1000_v44, %v3591_v42  ;;  %v1450_v51 = vcombine.low %v970_v37, %v977_v38  ;;  %2184 = vperm.xlu0 %3363, %v2091_v31   ;;  %v2382_v57 = vsel %vm1998_vm2, 1, %v3399_v3  ;;  %v427_v49 = vrot.slane %v413_v46, %v3605_v50 }
  0x62   : > { %v1451_v58 = vcombine.low %v984_v39, %v991_v45  ;;  %v1459_v59 = vrot.slane %v1449_v47, %v3605_v50  ;;  %v2381_v11 = vsel %vm1997_vm3, 1, %v3399_v3  ;;  %v428_v14 = vcombine.high %v420_v53, %v420_v53 }
  0x63   : > { %v1452_v12 = vcombine.low %v998_v43, %v1005_v32  ;;  %v1466_v13 = vrot.slane %v1450_v51, %v3605_v50  ;;  %v503_v15 = vunpack.i.h.s16 %v420_v53  ;;  %v429_v36 = vcombine.high %v427_v49, %v427_v49 }
  0x64   : > { %v1473_v8 = vrot.slane %v1451_v58, %v3605_v50  ;;  %v505_v19 = vunpack.i.h.s16 %v427_v49  ;;  %v3267_v4 = vpack.i.b16 %v420_v53, %v420_v53  ;;  %v507_v56 = vunpack.i.h.s16 %v428_v14  ;;  %2417 = vperm.xlu1 %3364, %v2382_v57  }
  0x65   : > { %v1480_v20 = vrot.slane %v1452_v12, %v3605_v50  ;;  %v1481_v21 = vcombine.low %v1459_v59, %v1466_v13  ;;  %v567_v23 = vpack.i.b16 %v503_v15, %v503_v15  ;;  %2414 = vperm.xlu0 %3363, %v2381_v11   ;;  %v509_v46 = vunpack.i.h.s16 %v429_v36 }
  0x66   : > { %v3268_v1 = vpack.i.b16 %v427_v49, %v427_v49  ;;  %v569_v24 = vpack.i.b16 %v505_v19, %v505_v19  ;;  %v3269_v25 = vpack.i.b16 %v428_v14, %v428_v14  ;;  %v571_v7 = vpack.i.b16 %v507_v56, %v507_v56 }
  0x67   : > { %v1482_v18 = vcombine.low %v1473_v8, %v1480_v20  ;;  %v1489_v62 = vrot.slane %v1481_v21, %v3605_v50  ;;  %v3270_v28 = vpack.i.b16 %v429_v36, %v429_v36  ;;  %v573_v29 = vpack.i.b16 %v509_v46, %v509_v46  ;;  %v3238_v36 = vld.sshfl [vmem:[%s3589_s16 + $0xc] sm:$0x33 pattern:$0x75316420] }
  0x68   : > { %v777_v60 = vrot.slane %v3267_v4, %v3591_v42  ;;  %v781_v30 = vrot.slane %v567_v23, %v3591_v42  ;;  %v785_v33 = vrot.slane %v3268_v1, %v3591_v42  ;;  %v789_v34 = vrot.slane %v569_v24, %v3591_v42 }
  0x69   : > { %v1496_v61 = vrot.slane %v1482_v18, %v3605_v50  ;;  %v793_v63 = vrot.slane %v3269_v25, %v3591_v42  ;;  %v797_v37 = vrot.slane %v571_v7, %v3591_v42  ;;  %v801_v17 = vrot.slane %v3270_v28, %v3591_v42 }
  0x6a   : > { %v805_v38 = vrot.slane %v573_v29, %v3591_v42  ;;  %v1175_v39 = vpack.i.b16 %v777_v60, %v777_v60  ;;  %v1182_v43 = vpack.i.b16 %v781_v30, %v781_v30  ;;  %v1189_v45 = vpack.i.b16 %v785_v33, %v785_v33 }
  0x6b   : > { %v1497_v44 = vcombine.low %v1489_v62, %v1496_v61  ;;  %v1196_v47 = vpack.i.b16 %v789_v34, %v789_v34  ;;  %v1203_v48 = vpack.i.b16 %v793_v63, %v793_v63  ;;  %v1210_v51 = vpack.i.b16 %v797_v37, %v797_v37 }
  0x6c   : > { %v1180_v31 = vrot.slane %v1175_v39, %v3591_v42  ;;  %v1187_v32 = vrot.slane %v1182_v43, %v3591_v42  ;;  %v1217_v53 = vpack.i.b16 %v801_v17, %v801_v17  ;;  %v1194_v57 = vrot.slane %v1189_v45, %v3591_v42 }
  0x6d   : > { %3324 = vmatprep.mubr.msk.bf16.mxu0 %vm1743_vm7, %v1497_v44  ;;  %v1201_v58 = vrot.slane %v1196_v47, %v3591_v42  ;;  %v1208_v59 = vrot.slane %v1203_v48, %v3591_v42  ;;  %v1224_v49 = vpack.i.b16 %v805_v38, %v805_v38  ;;  %v1215_v11 = vrot.slane %v1210_v51, %v3591_v42 }
  0x6e   : > { %3325 = vmatmul.mubr.msk.bf16.gmra.mxu0 %vm1743_vm7, %v1497_v44  ;;  %v1222_v12 = vrot.slane %v1217_v53, %v3591_v42  ;;  %v1645_v13 = vcombine.low %v1180_v31, %v1187_v32  ;;  %v2384_v8 = vsel %vm2000_vm4, 1, %v3399_v3  ;;  %v2383_v20 = vsel %vm1999_vm5, 1, %v3399_v3 }
  0x6f   : > { %v1229_v14 = vrot.slane %v1224_v49, %v3591_v42  ;;  %v1646_v15 = vcombine.low %v1194_v57, %v1201_v58  ;;  %v1647_v19 = vcombine.low %v1208_v59, %v1215_v11  ;;  %2423 = vperm.xlu1 %3364, %v2384_v8   ;;  %vm2002_vm6 = vcmp.eq.s32.totalorder %v3468_v5, 1  ;;  %2420 = vperm.xlu0 %3363, %v2383_v20  }
  0x70   : > { %v1655_v4 = vrot.slane %v1645_v13, %v3605_v50  ;;  %v2386_v2 = vsel %vm2002_vm6, 1, %v3399_v3  ;;  %vm2001_vm8 = vcmp.eq.s32.totalorder %v3473_v6, 1  ;;  %v341_v46 = vcombine.high %v3238_v36, %v3238_v36 }
  0x71   : > { %v1648_v21 = vcombine.low %v1222_v12, %v1229_v14  ;;  %v1662_v56 = vrot.slane %v1646_v15, %v3605_v50  ;;  %v1669_v23 = vrot.slane %v1647_v19, %v3605_v50  ;;  %v2385_v0 = vsel %vm2001_vm8, 1, %v3399_v3  ;;  %v3242_v15 = vld.sshfl [vmem:[%s3589_s16 + $0x1c] sm:$0x33 pattern:$0x75316420] }
  0x72   : > { %v348_v1 = vrot.slane %v3238_v36, %v3605_v50  ;;  %vm2004_vm9 = vcmp.eq.s32.totalorder %v3481_v9, 1  ;;  %vm2003_vm10 = vcmp.eq.s32.totalorder %v3486_v10, 1  ;;  %v355_v5 = vrot.slane %v341_v46, %v3605_v50 }
  0x73   : > { %v1676_v24 = vrot.slane %v1648_v21, %v3605_v50  ;;  %v1677_v25 = vcombine.low %v1655_v4, %v1662_v56  ;;  %2429 = vperm.xlu1 %3364, %v2386_v2   ;;  %2426 = vperm.xlu0 %3363, %v2385_v0   ;;  %v2388_v29 = vsel %vm2004_vm9, 1, %v3399_v3  ;;  %v2387_v60 = vsel %vm2003_vm10, 1, %v3399_v3 }
  0x74   : > { %v356_v18 = vcombine.high %v348_v1, %v348_v1  ;;  %v479_v62 = vunpack.i.h.s16 %v348_v1  ;;  %v3255_v6 = vpack.i.b16 %v348_v1, %v348_v1  ;;  %v357_v30 = vcombine.high %v355_v5, %v355_v5  ;;  %v3956_v1 = vld [vmem:[%s4920_s4 + $0x48] sm:$0xff] }
  0x75   : > { %v1678_v7 = vcombine.low %v1669_v23, %v1676_v24  ;;  %v1685_v28 = vrot.slane %v1677_v25, %v3605_v50  ;;  %v481_v33 = vunpack.i.h.s16 %v355_v5  ;;  %v3256_v34 = vpack.i.b16 %v355_v5, %v355_v5 }
  0x76   : > { %v483_v61 = vunpack.i.h.s16 %v356_v18  ;;  %v543_v9 = vpack.i.b16 %v479_v62, %v479_v62  ;;  %v3257_v63 = vpack.i.b16 %v356_v18, %v356_v18  ;;  %v681_v37 = vrot.slane %v3255_v6, %v3591_v42 }
  0x77   : > { %v1692_v10 = vrot.slane %v1678_v7, %v3605_v50  ;;  %v485_v17 = vunpack.i.h.s16 %v357_v30  ;;  %v545_v38 = vpack.i.b16 %v481_v33, %v481_v33  ;;  %v3258_v43 = vpack.i.b16 %v357_v30, %v357_v30  ;;  %2435 = vperm.xlu1 %3364, %v2388_v29   ;;  %2432 = vperm.xlu0 %3363, %v2387_v60  }
  0x78   : > { %v547_v39 = vpack.i.b16 %v483_v61, %v483_v61  ;;  %v685_v45 = vrot.slane %v543_v9, %v3591_v42  ;;  %v689_v47 = vrot.slane %v3256_v34, %v3591_v42  ;;  %v697_v48 = vrot.slane %v3257_v63, %v3591_v42 }
  0x79   : > { %v1693_v44 = vcombine.low %v1685_v28, %v1692_v10  ;;  %v549_v31 = vpack.i.b16 %v485_v17, %v485_v17  ;;  %v693_v32 = vrot.slane %v545_v38, %v3591_v42  ;;  %v705_v53 = vrot.slane %v3258_v43, %v3591_v42 }
  0x7a   : > { %v701_v51 = vrot.slane %v547_v39, %v3591_v42  ;;  %v1007_v57 = vpack.i.b16 %v681_v37, %v681_v37  ;;  %v1014_v58 = vpack.i.b16 %v685_v45, %v685_v45  ;;  %v1021_v59 = vpack.i.b16 %v689_v47, %v689_v47 }
  0x7b   : > { %3340 = vmatprep.mubr.msk.bf16.mxu1 %vm1743_vm7, %v1693_v44  ;;  %v1035_v49 = vpack.i.b16 %v697_v48, %v697_v48  ;;  %v709_v11 = vrot.slane %v549_v31, %v3591_v42  ;;  %v1028_v12 = vpack.i.b16 %v693_v32, %v693_v32  ;;  %v1049_v14 = vpack.i.b16 %v705_v53, %v705_v53 }
  0x7c   : > { %3341 = vmatmul.mubr.msk.bf16.gmra.mxu1 %vm1743_vm7, %v1693_v44  ;;  %v1042_v13 = vpack.i.b16 %v701_v51, %v701_v51  ;;  %v1012_v8 = vrot.slane %v1007_v57, %v3591_v42  ;;  %v1019_v36 = vrot.slane %v1014_v58, %v3591_v42  ;;  %v1026_v19 = vrot.slane %v1021_v59, %v3591_v42 }
  0x7d   : > { %v1040_v4 = vrot.slane %v1035_v49, %v3591_v42  ;;  %v1033_v20 = vrot.slane %v1028_v12, %v3591_v42  ;;  %v1054_v56 = vrot.slane %v1049_v14, %v3591_v42  ;;  %v1056_v2 = vpack.i.b16 %v709_v11, %v709_v11 }
  0x7e   : > { %v1047_v21 = vrot.slane %v1042_v13, %v3591_v42  ;;  %v1498_v23 = vcombine.low %v1012_v8, %v1019_v36  ;;  %v437_v0 = vcombine.high %v3242_v15, %v3242_v15  ;;  %v444_v46 = vrot.slane %v3242_v15, %v3605_v50 }
  0x7f   : > { %vm2006_vm11 = vcmp.eq.s32.totalorder %v3956_v1, 1  ;;  %v1061_v24 = vrot.slane %v1056_v2, %v3591_v42  ;;  %v1499_v25 = vcombine.low %v1026_v19, %v1033_v20  ;;  %vm2020_vm9 = vcmp.eq.s32.totalorder %v3705_v52, 1 }
  0x80   : > { %v1500_v5 = vcombine.low %v1040_v4, %v1047_v21  ;;  %v2390_v18 = vsel %vm2006_vm11, 1, %v3399_v3  ;;  %v1508_v62 = vrot.slane %v1498_v23, %v3605_v50  ;;  %v451_v6 = vrot.slane %v437_v0, %v3605_v50 }
  0x81   : > { %v452_v7 = vcombine.high %v444_v46, %v444_v46  ;;  %v511_v28 = vunpack.i.h.s16 %v444_v46  ;;  %2441 = vperm.xlu1 %3364, %v2390_v18   ;;  %v1501_v29 = vcombine.low %v1054_v56, %v1061_v24  ;;  %v1515_v60 = vrot.slane %v1499_v25, %v3605_v50  ;;  %v3986_v25 = vld [vmem:[%s4920_s4 + $0x40] sm:$0xff] }
  0x82   : > { %v1522_v30 = vrot.slane %v1500_v5, %v3605_v50  ;;  %v3271_v33 = vpack.i.b16 %v444_v46, %v444_v46  ;;  %v453_v61 = vcombine.high %v451_v6, %v451_v6  ;;  %v513_v9 = vunpack.i.h.s16 %v451_v6 }
  0x83   : > { %v515_v10 = vunpack.i.h.s16 %v452_v7  ;;  %v575_v34 = vpack.i.b16 %v511_v28, %v511_v28  ;;  %v1529_v63 = vrot.slane %v1501_v29, %v3605_v50  ;;  %v1530_v37 = vcombine.low %v1508_v62, %v1515_v60  ;;  %v3998_v60 = vld [vmem:[%s4920_s4 + $0x58] sm:$0xff] }
  0x84   : > { %v3272_v17 = vpack.i.b16 %v451_v6, %v451_v6  ;;  %v3273_v38 = vpack.i.b16 %v452_v7, %v452_v7  ;;  %v517_v39 = vunpack.i.h.s16 %v453_v61  ;;  %v577_v43 = vpack.i.b16 %v513_v9, %v513_v9 }
  0x85   : > { %v579_v44 = vpack.i.b16 %v515_v10, %v515_v10  ;;  %v3274_v45 = vpack.i.b16 %v453_v61, %v453_v61  ;;  %v1531_v47 = vcombine.low %v1522_v30, %v1529_v63  ;;  %v1538_v48 = vrot.slane %v1530_v37, %v3605_v50  ;;  %v4004_v30 = vld [vmem:[%s4920_s4 + $0x50] sm:$0xff]  ;;  %v4015_v63 = vld [vmem:[%s4920_s4 + $0x68] sm:$0xff]  ;;  %v4021_v37 = vld [vmem:[%s4920_s4 + $0x60] sm:$0xff] }
  0x86   : > { %v809_v31 = vrot.slane %v3271_v33, %v3591_v42  ;;  %v813_v32 = vrot.slane %v575_v34, %v3591_v42  ;;  %v581_v51 = vpack.i.b16 %v517_v39, %v517_v39  ;;  %v817_v53 = vrot.slane %v3272_v17, %v3591_v42 }
  0x87   : > { %v821_v57 = vrot.slane %v577_v43, %v3591_v42  ;;  %v825_v58 = vrot.slane %v3273_v38, %v3591_v42  ;;  %v1545_v59 = vrot.slane %v1531_v47, %v3605_v50  ;;  %v829_v49 = vrot.slane %v579_v44, %v3591_v42  ;;  %v4031_v44 = vld [vmem:[%s4920_s4 + $0x78] sm:$0xff] }
  0x88   : > { %v833_v11 = vrot.slane %v3274_v45, %v3591_v42  ;;  %v1231_v12 = vpack.i.b16 %v809_v31, %v809_v31  ;;  %v837_v13 = vrot.slane %v581_v51, %v3591_v42  ;;  %v1238_v14 = vpack.i.b16 %v813_v32, %v813_v32  ;;  %v4041_v32 = vld [vmem:[%s4920_s4 + $0x70] sm:$0xff] }
  0x89   : > { %v1245_v15 = vpack.i.b16 %v817_v53, %v817_v53  ;;  %v1252_v8 = vpack.i.b16 %v821_v57, %v821_v57  ;;  %v1546_v36 = vcombine.low %v1538_v48, %v1545_v59  ;;  %v1259_v4 = vpack.i.b16 %v825_v58, %v825_v58  ;;  %v3992_v7 = vpop.permute.xlu1 %2100  ;;  %v4025_v39 = vpop.permute.xlu0 %2094  ;;  %v4049_v57 = vld [vmem:[%s4920_s4 + $0x88] sm:$0xff] }
  0x8a   : > { %v1236_v19 = vrot.slane %v1231_v12, %v3591_v42  ;;  %v1266_v20 = vpack.i.b16 %v829_v49, %v829_v49  ;;  %v1243_v21 = vrot.slane %v1238_v14, %v3591_v42  ;;  %v1273_v23 = vpack.i.b16 %v833_v11, %v833_v11  ;;  %v4058_v11 = vld [vmem:[%s4920_s4 + $0x80] sm:$0xff] }
  0x8b   : > { %v1250_v56 = vrot.slane %v1245_v15, %v3591_v42  ;;  %v1257_v2 = vrot.slane %v1252_v8, %v3591_v42  ;;  %3328 = vmatprep.mubr.msk.bf16.mxu0 %vm1743_vm7, %v1546_v36  ;;  %v1264_v0 = vrot.slane %v1259_v4, %v3591_v42  ;;  %v1280_v24 = vpack.i.b16 %v837_v13, %v837_v13  ;;  %v4068_v13 = vld [vmem:[%s4920_s4 + $0x98] sm:$0xff]  ;;  %v4076_v15 = vld [vmem:[%s4920_s4 + $0x90] sm:$0xff] }
  0x8c   : > { %v1271_v46 = vrot.slane %v1266_v20, %v3591_v42  ;;  %vm2005_vm12 = vcmp.eq.s32.totalorder %v3986_v25, 1  ;;  %3329 = vmatmul.mubr.msk.bf16.gmra.mxu0 %vm1743_vm7, %v1546_v36  ;;  %v1278_v5 = vrot.slane %v1273_v23, %v3591_v42  ;;  %v1694_v18 = vcombine.low %v1236_v19, %v1243_v21  ;;  %v4085_v19 = vld [vmem:[%s4920_s4 + $0xa8] sm:$0xff]  ;;  %v4094_v21 = vld [vmem:[%s4920_s4 + $0xa0] sm:$0xff] }
  0x8d   : > { %v1695_v62 = vcombine.low %v1250_v56, %v1257_v2  ;;  %v2389_v6 = vsel %vm2005_vm12, 1, %v3399_v3  ;;  %v1285_v28 = vrot.slane %v1280_v24, %v3591_v42  ;;  %vm2008_vm13 = vcmp.eq.s32.totalorder %v3998_v60, 1  ;;  %v4035_v47 = vpop.permute.xlu1 %2103  ;;  %v4053_v59 = vpop.permute.xlu0 %2097 }
  0x8e   : > { %v1696_v29 = vcombine.low %v1264_v0, %v1271_v46  ;;  %2438 = vperm.xlu0 %3363, %v2389_v6   ;;  %vm2007_vm14 = vcmp.eq.s32.totalorder %v4004_v30, 1  ;;  %v1704_v33 = vrot.slane %v1694_v18, %v3605_v50  ;;  %v2392_v61 = vsel %vm2008_vm13, 1, %v3399_v3 }
  0x8f   : > { %v1711_v42 = vrot.slane %v1695_v62, %v3605_v50  ;;  %v2391_v9 = vsel %vm2007_vm14, 1, %v3399_v3  ;;  %v1697_v10 = vcombine.low %v1278_v5, %v1285_v28  ;;  %2447 = vperm.xlu1 %3364, %v2392_v61   ;;  %vm2010_vm15 = vcmp.eq.s32.totalorder %v4015_v63, 1  ;;  %v3379_v61 = vld [vmem:[%s4920_s4 + $0x8] sm:$0xff] }
  0x90   : > { %v1718_v34 = vrot.slane %v1696_v29, %v3605_v50  ;;  %vm2009_vm0 = vcmp.eq.s32.totalorder %v4021_v37, 1  ;;  %v2394_v38 = vsel %vm2010_vm15, 1, %v3399_v3  ;;  %vm2012_vm1 = vcmp.eq.s32.totalorder %v4031_v44, 1 }
  0x91   : > { %v1726_v17 = vcombine.low %v1704_v33, %v1711_v42  ;;  %v1725_v43 = vrot.slane %v1697_v10, %v3605_v50  ;;  %v2393_v45 = vsel %vm2009_vm0, 1, %v3399_v3  ;;  %vm2011_vm2 = vcmp.eq.s32.totalorder %v4041_v32, 1  ;;  %v4062_v12 = vpop.permute.xlu1 %2109  ;;  %v4080_v36 = vpop.permute.xlu0 %2106 }
  0x92   : > { %2444 = vperm.xlu0 %3363, %v2391_v9   ;;  %v2396_v51 = vsel %vm2012_vm1, 1, %v3399_v3  ;;  %vm2014_vm3 = vcmp.eq.s32.totalorder %v4049_v57, 1  ;;  %v2395_v58 = vsel %vm2011_vm2, 1, %v3399_v3  ;;  %vm2013_vm4 = vcmp.eq.s32.totalorder %v4058_v11, 1 }
  0x93   : > { %v1727_v48 = vcombine.low %v1718_v34, %v1725_v43  ;;  %v1734_v31 = vrot.slane %v1726_v17, %v3605_v50  ;;  %2453 = vperm.xlu1 %3364, %v2394_v38   ;;  %vm2016_vm5 = vcmp.eq.s32.totalorder %v4068_v13, 1  ;;  %v2397_v14 = vsel %vm2013_vm4, 1, %v3399_v3  ;;  %v3380_v34 = vld [vmem:[%s4920_s4] sm:$0xff]  ;;  %v3381_v38 = vld [vmem:[%s4920_s4 + $0x18] sm:$0xff] }
  0x94   : > { %vm2015_vm6 = vcmp.eq.s32.totalorder %v4076_v15, 1  ;;  %v2400_v8 = vsel %vm2016_vm5, 1, %v3399_v3  ;;  %vm2017_vm8 = vcmp.eq.s32.totalorder %v4094_v21, 1  ;;  %vm2019_vm10 = vcmp.eq.s32.totalorder %v3742_v54, 1 }
  0x95   : > { %v1741_v53 = vrot.slane %v1727_v48, %v3605_v50  ;;  %v2398_v50 = vsel %vm2014_vm3, 1, %v3399_v3  ;;  %v2399_v4 = vsel %vm2015_vm6, 1, %v3399_v3  ;;  %v4089_v20 = vpop.permute.xlu1 %2115  ;;  %v2401_v2 = vsel %vm2017_vm8, 1, %v3399_v3  ;;  %v4100_v23 = vpop.permute.xlu0 %2112  ;;  %v3382_v48 = vld [vmem:[%s4920_s4 + $0x10] sm:$0xff] }
  0x96   : > { %2450 = vperm.xlu0 %3363, %v2393_v45   ;;  %v2404_v0 = vsel %vm2020_vm9, 1, %v3399_v3  ;;  %vm2022_vm11 = vcmp.eq.s32.totalorder %v3753_v16, 1  ;;  %v2403_v24 = vsel %vm2019_vm10, 1, %v3399_v3  ;;  %vm2021_vm12 = vcmp.eq.s32.totalorder %v3762_v55, 1 }
  0x97   : > { %v1742_v49 = vcombine.low %v1734_v31, %v1741_v53  ;;  %2459 = vperm.xlu1 %3364, %v2396_v51   ;;  %v2406_v52 = vsel %vm2022_vm11, 1, %v3399_v3  ;;  %vm2024_vm13 = vcmp.eq.s32.totalorder %v3792_v35, 1  ;;  %v2405_v54 = vsel %vm2021_vm12, 1, %v3399_v3  ;;  %v3383_v53 = vld [vmem:[%s4920_s4 + $0x28] sm:$0xff] }
  0x98   : > { %vm2023_vm14 = vcmp.eq.s32.totalorder %v3800_v22, 1  ;;  %v2408_v16 = vsel %vm2024_vm13, 1, %v3399_v3  ;;  %vm2026_vm15 = vcmp.eq.s32.totalorder %v3811_v26, 1  ;;  %vm2025_vm0 = vcmp.eq.s32.totalorder %v3819_v27, 1 }
  0x99   : > { %3344 = vmatprep.mubr.msk.bf16.mxu1 %vm1743_vm7, %v1742_v49  ;;  %v4104_v46 = vpop.permute.xlu1 %2121  ;;  %v4110_v5 = vpop.permute.xlu0 %2118  ;;  %v2407_v55 = vsel %vm2023_vm14, 1, %v3399_v3  ;;  %v2410_v6 = vsel %vm2026_vm15, 1, %v3399_v3  ;;  %vm2028_vm1 = vcmp.eq.s32.totalorder %v3828_v40, 1  ;;  %v2409_v29 = vsel %vm2025_vm0, 1, %v3399_v3 }
  0x9a   : > { %2456 = vperm.xlu0 %3363, %v2395_v58   ;;  %3345 = vmatmul.mubr.msk.bf16.gmra.mxu1 %vm1743_vm7, %v1742_v49  ;;  %vm2018_vm7 = vcmp.eq.s32.totalorder %v4085_v19, 1  ;;  %vm2027_vm2 = vcmp.eq.s32.totalorder %v3833_v41, 1  ;;  %v2412_v33 = vsel %vm2028_vm1, 1, %v3399_v3  ;;  %vm1966_vm3 = vcmp.eq.s32.totalorder %v3379_v61, 0  ;;  %v3384_v49 = vld [vmem:[%s4920_s4 + $0x20] sm:$0xff] }
  0x9b   : > { %2465 = vperm.xlu1 %3364, %v2398_v50   ;;  %v2402_v56 = vsel %vm2018_vm7, 1, %v3399_v3  ;;  %v2411_v9 = vsel %vm2027_vm2, 1, %v3399_v3  ;;  %vm1965_vm4 = vcmp.eq.s32.totalorder %v3380_v34, 0  ;;  %v2702_v17 = vsel %vm1966_vm3, 1, %v3399_v3 }
  0x9c   : > { %vm1968_vm5 = vcmp.eq.s32.totalorder %v3381_v38, 0  ;;  %v2701_v43 = vsel %vm1965_vm4, 1, %v3399_v3  ;;  %vm1967_vm6 = vcmp.eq.s32.totalorder %v3382_v48, 0  ;;  %vm1970_vm7 = vcmp.eq.s32.totalorder %v3383_v53, 0 }
  0x9d   : > { %v4114_v18 = vpop.permute.xlu1 %2127  ;;  %v4120_v62 = vpop.permute.xlu0 %2124  ;;  %v2704_v31 = vsel %vm1968_vm5, 1, %v3399_v3  ;;  %v2703_v58 = vsel %vm1967_vm6, 1, %v3399_v3  ;;  %vm1969_vm8 = vcmp.eq.s32.totalorder %v3384_v49, 0  ;;  %v2706_v50 = vsel %vm1970_vm7, 1, %v3399_v3  ;;  %v3390_v49 = vld [vmem:[%s4920_s4 + $0xc0] sm:$0xff] }
  0x9e   : > { %2462 = vperm.xlu0 %3363, %v2397_v14   ;;  %vm1974_vm11 = vcmp.eq.s32.totalorder %v3956_v1, 0  ;;  %vm1973_vm12 = vcmp.eq.s32.totalorder %v3986_v25, 0  ;;  %vm1976_vm13 = vcmp.eq.s32.totalorder %v3998_v60, 0  ;;  %vm1975_vm14 = vcmp.eq.s32.totalorder %v4004_v30, 0 }
  0x9f   : > { %2471 = vperm.xlu1 %3364, %v2400_v8   ;;  %v3385_v8 = vld [vmem:[%s4920_s4 + $0x38] sm:$0xff]  ;;  %v2712_v1 = vsel %vm1976_vm13, 1, %v3399_v3  ;;  %vm1978_vm15 = vcmp.eq.s32.totalorder %v4015_v63, 0  ;;  %v2711_v25 = vsel %vm1975_vm14, 1, %v3399_v3  ;;  %vm1977_vm0 = vcmp.eq.s32.totalorder %v4021_v37, 0 }
  0xa0   : > { %vm1972_vm9 = vcmp.eq.s32.totalorder %v3385_v8, 0  ;;  %v2714_v60 = vsel %vm1978_vm15, 1, %v3399_v3  ;;  %vm1980_vm1 = vcmp.eq.s32.totalorder %v4031_v44, 0  ;;  %v2713_v30 = vsel %vm1977_vm0, 1, %v3399_v3 }
  0xa1   : > { %v4124_v28 = vpop.permute.xlu1 %2133  ;;  %v4130_v42 = vpop.permute.xlu0 %2130  ;;  %vm1979_vm2 = vcmp.eq.s32.totalorder %v4041_v32, 0  ;;  %v2716_v63 = vsel %vm1980_vm1, 1, %v3399_v3  ;;  %vm1982_vm3 = vcmp.eq.s32.totalorder %v4049_v57, 0  ;;  %vm1981_vm4 = vcmp.eq.s32.totalorder %v4058_v11, 0 }
  0xa2   : > { %2468 = vperm.xlu0 %3363, %v2399_v4   ;;  %4931 = vst [vmem:[#allocation2_spill] sm:$0xff] %v4124_v28  ;;  %4932 = vst [vmem:[#allocation3_spill] sm:$0xff] %v4130_v42  ;;  %v2705_v4 = vsel %vm1969_vm8, 1, %v3399_v3  ;;  %v2715_v37 = vsel %vm1979_vm2, 1, %v3399_v3  ;;  %v2718_v44 = vsel %vm1982_vm3, 1, %v3399_v3  ;;  %vm1984_vm5 = vcmp.eq.s32.totalorder %v4068_v13, 0 }
  0xa3   : > { %2477 = vperm.xlu1 %3364, %v2402_v56   ;;  %v2717_v32 = vsel %vm1981_vm4, 1, %v3399_v3  ;;  %vm1983_vm6 = vcmp.eq.s32.totalorder %v4076_v15, 0  ;;  %v2720_v57 = vsel %vm1984_vm5, 1, %v3399_v3  ;;  %vm1986_vm7 = vcmp.eq.s32.totalorder %v4085_v19, 0  ;;  %v3387_v15 = vld [vmem:[%s4920_s4 + $0xb8] sm:$0xff]  ;;  %v3388_v19 = vld [vmem:[%s4920_s4 + $0xb0] sm:$0xff] }
  0xa4   : > { %v2719_v11 = vsel %vm1983_vm6, 1, %v3399_v3  ;;  %vm1985_vm8 = vcmp.eq.s32.totalorder %v4094_v21, 0  ;;  %v2722_v13 = vsel %vm1986_vm7, 1, %v3399_v3  ;;  %vm1992_vm13 = vcmp.eq.s32.totalorder %v3792_v35, 0 }
  0xa5   : > { %v4136_v10 = vpop.permute.xlu1 %2139  ;;  %v4146_v45 = vpop.permute.xlu0 %2136  ;;  %vm1991_vm14 = vcmp.eq.s32.totalorder %v3800_v22, 0  ;;  %vm1994_vm15 = vcmp.eq.s32.totalorder %v3811_v26, 0  ;;  %vm1993_vm0 = vcmp.eq.s32.totalorder %v3819_v27, 0  ;;  %vm1996_vm1 = vcmp.eq.s32.totalorder %v3828_v40, 0 }
  0xa6   : > { %2474 = vperm.xlu0 %3363, %v2401_v2   ;;  %v3386_v2 = vld [vmem:[%s4920_s4 + $0x30] sm:$0xff]  ;;  %v2730_v35 = vsel %vm1994_vm15, 1, %v3399_v3  ;;  %v2729_v22 = vsel %vm1993_vm0, 1, %v3399_v3  ;;  %vm1995_vm2 = vcmp.eq.s32.totalorder %v3833_v41, 0  ;;  %v2732_v26 = vsel %vm1996_vm1, 1, %v3399_v3 }
  0xa7   : > { %2483 = vperm.xlu1 %3364, %v2404_v0   ;;  %vm1971_vm10 = vcmp.eq.s32.totalorder %v3386_v2, 0  ;;  %v2708_v0 = vsel %vm1972_vm9, 1, %v3399_v3  ;;  %vm1988_vm9 = vcmp.eq.s32.totalorder %v3387_v15, 0  ;;  %v2728_v2 = vsel %vm1992_vm13, 1, %v3399_v3 }
  0xa8   : > { %v2724_v21 = vsel %vm1988_vm9, 1, %v3399_v3  ;;  %v2731_v27 = vsel %vm1995_vm2, 1, %v3399_v3  ;;  %vm2192_vm3 = vcmp.eq.s32.totalorder %v4035_v47, 1  ;;  %vm2191_vm4 = vcmp.eq.s32.totalorder %v3992_v7, 1 }
  0xa9   : > { %v4152_v51 = vpop.permute.xlu1 %2145  ;;  %vm2190_vm7 = vcmp.eq.s32.totalorder %v4053_v59, 1  ;;  %vm2194_vm0 = vcmp.eq.s32.totalorder %v4062_v12, 1 }
  0xaa   : > { %2480 = vperm.xlu0 %3363, %v2403_v24   ;;  %v4162_v14 = vpop.permute.xlu0 %2142  ;;  %v2707_v24 = vsel %vm1971_vm10, 1, %v3399_v3  ;;  %vm1987_vm10 = vcmp.eq.s32.totalorder %v3388_v19, 0  ;;  %vm2206_vm9 = vcmp.eq.s32.totalorder %v4152_v51, 1 }
  0xab   : > { %2489 = vperm.xlu1 %3364, %v2406_v52   ;;  %v2723_v53 = vsel %vm1987_vm10, 1, %v3399_v3  ;;  %vm2205_vm10 = vcmp.eq.s32.totalorder %v4162_v14, 1 }
  0xad   : > { %v4168_v56 = vpop.permute.xlu1 %2151 }
  0xae   : > { %2486 = vperm.xlu0 %3363, %v2405_v54   ;;  %v4176_v52 = vpop.permute.xlu0 %2148  ;;  %v2710_v54 = vsel %vm1974_vm11, 1, %v3399_v3  ;;  %vm2208_vm5 = vcmp.eq.s32.totalorder %v4168_v56, 1 }
  0xaf   : > { %2495 = vperm.xlu1 %3364, %v2408_v16   ;;  %vm2207_vm6 = vcmp.eq.s32.totalorder %v4176_v52, 1 }
  0xb1   : > { %v4180_v16 = vpop.permute.xlu1 %2157 }
  0xb2   : > { %2492 = vperm.xlu0 %3363, %v2407_v55   ;;  %v2709_v55 = vsel %vm1973_vm12, 1, %v3399_v3  ;;  %vm1989_vm12 = vcmp.eq.s32.totalorder %v3390_v49, 0  ;;  %vm2210_vm2 = vcmp.eq.s32.totalorder %v4180_v16, 1 }
  0xb3   : > { %2501 = vperm.xlu1 %3364, %v2410_v6   ;;  %v4186_v6 = vpop.permute.xlu0 %2154  ;;  %v2725_v8 = vsel %vm1989_vm12, 1, %v3399_v3  ;;  %vm2195_vm12 = vcmp.eq.s32.totalorder %v4100_v23, 1 }
  0xb4   : > { %vm2209_vm1 = vcmp.eq.s32.totalorder %v4186_v6, 1 }
  0xb6   : > { %2498 = vperm.xlu0 %3363, %v2409_v29  }
  0xb7   : > { %2507 = vperm.xlu1 %3364, %v2412_v33  }
  0xba   : > { %2504 = vperm.xlu0 %3363, %v2411_v9  }
  0xbb   : > { %2737 = vperm.xlu1 %3364, %v2702_v17  }
  0xbc   : > { %v4190_v29 = vpop.permute.xlu1 %2163 }
  0xbd   : > { %v4196_v33 = vpop.permute.xlu0 %2160  ;;  %vm2212_vm15 = vcmp.eq.s32.totalorder %v4190_v29, 1 }
  0xbe   : > { %2734 = vperm.xlu0 %3363, %v2701_v43   ;;  %v2721_v43 = vsel %vm1985_vm8, 1, %v3399_v3  ;;  %vm2189_vm8 = vcmp.eq.s32.totalorder %v4025_v39, 1  ;;  %vm2211_vm13 = vcmp.eq.s32.totalorder %v4196_v33, 1 }
  0xbf   : > { %2743 = vperm.xlu1 %3364, %v2704_v31   ;;  %v3389_v31 = vld [vmem:[%s4920_s4 + $0xc8] sm:$0xff] }
  0xc0   : > { %v4200_v61 = vpop.permute.xlu1 %2169  ;;  %vm1990_vm11 = vcmp.eq.s32.totalorder %v3389_v31, 0 }
  0xc2   : > { %2740 = vperm.xlu0 %3363, %v2703_v58  }
  0xc3   : > { %2749 = vperm.xlu1 %3364, %v2706_v50   ;;  %v2726_v50 = vsel %vm1990_vm11, 1, %v3399_v3  ;;  %vm2196_vm11 = vcmp.eq.s32.totalorder %v4089_v20, 1 }
  0xc6   : > { %2746 = vperm.xlu0 %3363, %v2705_v4  }
  0xc7   : > { %2755 = vperm.xlu1 %3364, %v2708_v0  }
  0xca   : > { %2752 = vperm.xlu0 %3363, %v2707_v24   ;;  %v4206_v9 = vpop.permute.xlu0 %2166  ;;  %v2727_v24 = vsel %vm1991_vm14, 1, %v3399_v3  ;;  %vm2193_vm14 = vcmp.eq.s32.totalorder %v4080_v36, 1 }
  0xcb   : > { %2761 = vperm.xlu1 %3364, %v2710_v54  }
  0xcc   : > { %v4210_v34 = vpop.permute.xlu1 %2175 }
  0xce   : > { %2758 = vperm.xlu0 %3363, %v2709_v55   ;;  %v4216_v17 = vpop.permute.xlu0 %2172 }
  0xcf   : > { %2767 = vperm.xlu1 %3364, %v2712_v1  }
  0xd0   : > { %v4220_v38 = vpop.permute.xlu1 %2181 }
  0xd1   : > { %4933 = vst [vmem:[#allocation4_spill] sm:$0xff] %v4220_v38 }
  0xd2   : > { %2764 = vperm.xlu0 %3363, %v2711_v25   ;;  %v4230_v48 = vpop.permute.xlu0 %2178 }
  0xd3   : > { %2773 = vperm.xlu1 %3364, %v2714_v60   ;;  %4934 = vst [vmem:[#allocation5_spill] sm:$0xff] %v4230_v48 }
  0xd6   : > { %2770 = vperm.xlu0 %3363, %v2713_v30  }
  0xd7   : > { %2779 = vperm.xlu1 %3364, %v2716_v63  }
  0xda   : > { %2776 = vperm.xlu0 %3363, %v2715_v37  }
  0xdb   : > { %2785 = vperm.xlu1 %3364, %v2718_v44   ;;  %v4236_v58 = vpop.permute.xlu1 %2187 }
  0xdc   : > { %4935 = vst [vmem:[#allocation6_spill] sm:$0xff] %v4236_v58  ;;  %v4244_v4 = vpop.permute.xlu0 %2184 }
  0xde   : > { %2782 = vperm.xlu0 %3363, %v2717_v32  }
  0xdf   : > { %2791 = vperm.xlu1 %3364, %v2720_v57   ;;  %v4248_v0 = vpop.permute.xlu1 %2417 }
  0xe0   : > { %4936 = vst [vmem:[#allocation7_spill] sm:$0xff] %v4248_v0  ;;  %v4254_v54 = vpop.permute.xlu0 %2414 }
  0xe1   : > { %4937 = vst [vmem:[#allocation8_spill] sm:$0xff] %v4254_v54 }
  0xe2   : > { %2788 = vperm.xlu0 %3363, %v2719_v11  }
  0xe3   : > { %2797 = vperm.xlu1 %3364, %v2722_v13  }
  0xe6   : > { %2794 = vperm.xlu0 %3363, %v2721_v43  }
  0xe7   : > { %2803 = vperm.xlu1 %3364, %v2724_v21  }
  0xea   : > { %2800 = vperm.xlu0 %3363, %v2723_v53   ;;  %v4258_v55 = vpop.permute.xlu1 %2423  ;;  %v4265_v25 = vpop.permute.xlu0 %2420 }
  0xeb   : > { %2809 = vperm.xlu1 %3364, %v2726_v50   ;;  %4938 = vst [vmem:[#allocation9_spill] sm:$0xff] %v4258_v55  ;;  %4939 = vst [vmem:[#allocation10_spill] sm:$0xff] %v4265_v25 }
  0xee   : > { %2806 = vperm.xlu0 %3363, %v2725_v8   ;;  %v4269_v40 = vpop.permute.xlu1 %2429  ;;  %v4275_v41 = vpop.permute.xlu0 %2426 }
  0xef   : > { %2815 = vperm.xlu1 %3364, %v2728_v2   ;;  %4940 = vst [vmem:[#allocation11_spill] sm:$0xff] %v4269_v40  ;;  %4941 = vst [vmem:[#allocation12_spill] sm:$0xff] %v4275_v41 }
  0xf2   : > { %2812 = vperm.xlu0 %3363, %v2727_v24   ;;  %v4279_v3 = vpop.permute.xlu1 %2435  ;;  %v4281_v63 = vpop.permute.xlu0 %2432 }
  0xf3   : > { %2821 = vperm.xlu1 %3364, %v2730_v35   ;;  %4942 = vst [vmem:[#allocation13_spill] sm:$0xff] %v4279_v3  ;;  %4943 = vst [vmem:[#allocation14_spill] sm:$0xff] %v4281_v63 }
  0xf4   : > { %v4262_v1 = vpop.f32.mrf.mxu0 }
  0xf6   : > { %2818 = vperm.xlu0 %3363, %v2729_v22   ;;  %v4267_v60 = vpop.f32.mrf.mxu0 }
  0xf7   : > { %2827 = vperm.xlu1 %3364, %v2732_v26  }
  0xf8   : > { %v4271_v30 = vpop.f32.mrf.mxu0 }
  0xfa   : > { %2824 = vperm.xlu0 %3363, %v2731_v27   ;;  %v4301_v15 = vpop.f32.mrf.mxu0 }
  0xfb   : > { %2259 = vrot.lane.b32.xlu1 %v4271_v30, %s3401_s28 }
  0xfc   : > { %v4287_v44 = vpop.permute.xlu1 %2441 }
  0xfd   : > { %4944 = vst [vmem:[#allocation15_spill] sm:$0xff] %v4287_v44 }
  0xfe   : > { %2257 = vrot.lane.b32.xlu0 %v4262_v1, %s3401_s28 }
 0x102   : > { %v4283_v37 = vpop.f32.mrf.mxu1 }
 0x103   : > { %2289 = vrot.lane.b32.xlu0 %v4283_v37, %s3401_s28 }
 0x104   : > { %v4289_v32 = vpop.f32.mrf.mxu1 }
 0x106   : > { %v4291_v57 = vpop.f32.mrf.mxu1 }
 0x107   : > { %2253 = vrot.lane.b32.xlu0 %v4267_v60, %s3401_s28  ;;  %2291 = vrot.lane.b32.xlu1 %v4291_v57, %s3401_s28 }
 0x108   : > { %v4309_v19 = vpop.f32.mrf.mxu1 }
 0x109   : > { %v4297_v11 = vpop.permute.xlu0 %2438 }
 0x10a   : > { %4945 = vst [vmem:[#allocation16_spill] sm:$0xff] %v4297_v11  ;;  %v4299_v13 = vpop.permute.xlu1 %2447 }
 0x10b   : > { %4946 = vst [vmem:[#allocation17_spill] sm:$0xff] %v4299_v13  ;;  %2285 = vrot.lane.b32.xlu0 %v4289_v32, %s3401_s28  ;;  %2255 = vrot.lane.b32.xlu1 %v4301_v15, %s3401_s28 }
 0x10d   : > { %v4307_v43 = vpop.permute.xlu0 %2444 }
 0x10e   : > { %4947 = vst [vmem:[#allocation18_spill] sm:$0xff] %v4307_v43  ;;  %v4311_v21 = vpop.permute.xlu1 %2453  ;;  %v4313_v31 = vpop.f32.mrf.mxu0 }
 0x10f   : > { %4948 = vst [vmem:[#allocation19_spill] sm:$0xff] %v4311_v21  ;;  %2287 = vrot.lane.b32.xlu1 %v4309_v19, %s3401_s28  ;;  %2265 = vrot.lane.b32.xlu0 %v4313_v31, %s3401_s28 }
 0x110   : > { %v4321_v49 = vpop.f32.mrf.mxu0 }
 0x111   : > { %v4319_v53 = vpop.permute.xlu0 %2450 }
 0x112   : > { %4949 = vst [vmem:[#allocation20_spill] sm:$0xff] %v4319_v53  ;;  %v4323_v50 = vpop.permute.xlu1 %2459  ;;  %v4325_v8 = vpop.f32.mrf.mxu0 }
 0x113   : > { %4950 = vst [vmem:[#allocation21_spill] sm:$0xff] %v4323_v50  ;;  %2267 = vrot.lane.b32.xlu1 %v4325_v8, %s3401_s28 }
 0x114   : > { %v4359_v13 = vpop.f32.mrf.mxu0 }
 0x115   : > { %v4329_v2 = vpop.permute.xlu0 %2456 }
 0x116   : > { %4951 = vst [vmem:[#allocation22_spill] sm:$0xff] %v4329_v2  ;;  %v4331_v24 = vpop.permute.xlu1 %2465 }
 0x117   : > { %4952 = vst [vmem:[#allocation23_spill] sm:$0xff] %v4331_v24 }
 0x119   : > { %v4333_v35 = vpop.permute.xlu0 %2462 }
 0x11a   : > { %4953 = vst [vmem:[#allocation24_spill] sm:$0xff] %v4333_v35  ;;  %v4335_v22 = vpop.permute.xlu1 %2471 }
 0x11b   : > { %4954 = vst [vmem:[#allocation25_spill] sm:$0xff] %v4335_v22 }
 0x11c   : > { %v4339_v27 = vpop.f32.mrf.mxu1 }
 0x11d   : > { %v4337_v26 = vpop.permute.xlu0 %2468  ;;  %2297 = vrot.lane.b32.xlu0 %v4339_v27, %s3401_s28 }
 0x11e   : > { %4955 = vst [vmem:[#allocation26_spill] sm:$0xff] %v4337_v26  ;;  %v4343_v21 = vpop.permute.xlu1 %2477  ;;  %v4345_v53 = vpop.f32.mrf.mxu1 }
 0x11f   : > { %4956 = vst [vmem:[#allocation27_spill] sm:$0xff] %v4343_v21 }
 0x120   : > { %v4349_v2 = vpop.f32.mrf.mxu1 }
 0x121   : > { %v4347_v50 = vpop.permute.xlu0 %2474  ;;  %2261 = vrot.lane.b32.xlu0 %v4321_v49, %s3401_s28  ;;  %2299 = vrot.lane.b32.xlu1 %v4349_v2, %s3401_s28 }
 0x122   : > { %4957 = vst [vmem:[#allocation28_spill] sm:$0xff] %v4347_v50  ;;  %v4355_v44 = vpop.permute.xlu1 %2483  ;;  %v4369_v50 = vpop.f32.mrf.mxu1 }
 0x123   : > { %4958 = vst [vmem:[#allocation29_spill] sm:$0xff] %v4355_v44 }
 0x125   : > { %v4357_v11 = vpop.permute.xlu0 %2480  ;;  %2293 = vrot.lane.b32.xlu0 %v4345_v53, %s3401_s28  ;;  %2263 = vrot.lane.b32.xlu1 %v4359_v13, %s3401_s28 }
 0x126   : > { %4959 = vst [vmem:[#allocation30_spill] sm:$0xff] %v4357_v11  ;;  %v4365_v43 = vpop.permute.xlu1 %2489 }
 0x127   : > { %4960 = vst [vmem:[#allocation31_spill] sm:$0xff] %v4365_v43 }
 0x129   : > { %v4367_v21 = vpop.permute.xlu0 %2486  ;;  %2295 = vrot.lane.b32.xlu1 %v4369_v50, %s3401_s28 }
 0x12a   : > { %4961 = vst [vmem:[#allocation32_spill] sm:$0xff] %v4367_v21  ;;  %v4373_v40 = vpop.permute.xlu1 %2495 }
 0x12b   : > { %4962 = vst [vmem:[#allocation33_spill] sm:$0xff] %v4373_v40 }
 0x12d   : > { %v4375_v44 = vpop.permute.xlu0 %2492 }
 0x12e   : > { %4963 = vst [vmem:[#allocation34_spill] sm:$0xff] %v4375_v44  ;;  %v4377_v41 = vpop.f32.mrf.mxu0  ;;  %v4379_v11 = vpop.permute.xlu1 %2501 }
 0x12f   : > { %4964 = vst [vmem:[#allocation35_spill] sm:$0xff] %v4379_v11  ;;  %2273 = vrot.lane.b32.xlu0 %v4377_v41, %s3401_s28 }
 0x130   : > { %v4383_v63 = vpop.f32.mrf.mxu0 }
 0x131   : > { %v4385_v43 = vpop.permute.xlu0 %2498 }
 0x132   : > { %4965 = vst [vmem:[#allocation36_spill] sm:$0xff] %v4385_v43  ;;  %v4387_v21 = vpop.f32.mrf.mxu0  ;;  %v4389_v3 = vpop.permute.xlu1 %2507 }
 0x133   : > { %4966 = vst [vmem:[#allocation37_spill] sm:$0xff] %v4389_v3  ;;  %2275 = vrot.lane.b32.xlu1 %v4387_v21, %s3401_s28 }
 0x135   : > { %v4393_v40 = vpop.permute.xlu0 %2504 }
 0x136   : > { %4967 = vst [vmem:[#allocation38_spill] sm:$0xff] %v4393_v40  ;;  %v4395_v44 = vpop.permute.xlu1 %2737 }
 0x137   : > { %4968 = vst [vmem:[#allocation39_spill] sm:$0xff] %v4395_v44  ;;  %v4421_v44 = vpop.f32.mrf.mxu0 }
 0x139   : > { %v4397_v35 = vpop.permute.xlu0 %2734 }
 0x13a   : > { %4969 = vst [vmem:[#allocation40_spill] sm:$0xff] %v4397_v35  ;;  %v4399_v11 = vpop.permute.xlu1 %2743 }
 0x13b   : > { %4970 = vst [vmem:[#allocation41_spill] sm:$0xff] %v4399_v11 }
 0x13c   : > { %v4401_v24 = vpop.f32.mrf.mxu1 }
 0x13d   : > { %v4403_v54 = vpop.permute.xlu0 %2740  ;;  %2305 = vrot.lane.b32.xlu0 %v4401_v24, %s3401_s28 }
 0x13e   : > { %4971 = vst [vmem:[#allocation42_spill] sm:$0xff] %v4403_v54  ;;  %v4407_v43 = vpop.f32.mrf.mxu1  ;;  %v4409_v3 = vpop.permute.xlu1 %2749 }
 0x13f   : > { %4972 = vst [vmem:[#allocation43_spill] sm:$0xff] %v4409_v3 }
 0x140   : > { %v4411_v0 = vpop.f32.mrf.mxu1 }
 0x141   : > { %v4413_v40 = vpop.permute.xlu0 %2746  ;;  %2269 = vrot.lane.b32.xlu0 %v4383_v63, %s3401_s28  ;;  %2307 = vrot.lane.b32.xlu1 %v4411_v0, %s3401_s28 }
 0x142   : > { %4973 = vst [vmem:[#allocation44_spill] sm:$0xff] %v4413_v40  ;;  %v4419_v35 = vpop.permute.xlu1 %2755  ;;  %v4431_v40 = vpop.f32.mrf.mxu1 }
 0x143   : > { %4974 = vst [vmem:[#allocation45_spill] sm:$0xff] %v4419_v35 }
 0x145   : > { %v4423_v54 = vpop.permute.xlu0 %2752  ;;  %2301 = vrot.lane.b32.xlu0 %v4407_v43, %s3401_s28  ;;  %2271 = vrot.lane.b32.xlu1 %v4421_v44, %s3401_s28 }
 0x146   : > { %4975 = vst [vmem:[#allocation46_spill] sm:$0xff] %v4423_v54  ;;  %v4429_v3 = vpop.permute.xlu1 %2761 }
 0x147   : > { %4976 = vst [vmem:[#allocation47_spill] sm:$0xff] %v4429_v3 }
 0x149   : > { %v4433_v11 = vpop.permute.xlu0 %2758  ;;  %2303 = vrot.lane.b32.xlu1 %v4431_v40, %s3401_s28 }
 0x14a   : > { %4977 = vst [vmem:[#allocation48_spill] sm:$0xff] %v4433_v11  ;;  %v4437_v35 = vpop.permute.xlu1 %2767 }
 0x14b   : > { %4978 = vst [vmem:[#allocation49_spill] sm:$0xff] %v4437_v35 }
 0x14c   : > { %v4439_v26 = vpop.f32.mrf.mxu0 }
 0x14d   : > { %v4441_v54 = vpop.permute.xlu0 %2764  ;;  %2281 = vrot.lane.b32.xlu0 %v4439_v26, %s3401_s28 }
 0x14e   : > { %4979 = vst [vmem:[#allocation50_spill] sm:$0xff] %v4441_v54  ;;  %v4445_v22 = vpop.f32.mrf.mxu0  ;;  %v4447_v25 = vpop.permute.xlu1 %2773 }
 0x14f   : > { %4980 = vst [vmem:[#allocation51_spill] sm:$0xff] %v4445_v22  ;;  %4981 = vst [vmem:[#allocation52_spill] sm:$0xff] %v4447_v25 }
 0x150   : > { %v4449_v3 = vpop.f32.mrf.mxu0 }
 0x151   : > { %v4451_v55 = vpop.permute.xlu0 %2770  ;;  %2283 = vrot.lane.b32.xlu1 %v4449_v3, %s3401_s28 }
 0x152   : > { %4982 = vst [vmem:[#allocation53_spill] sm:$0xff] %v4451_v55  ;;  %v4455_v11 = vpop.permute.xlu1 %2779 }
 0x153   : > { %4983 = vst [vmem:[#allocation54_spill] sm:$0xff] %v4455_v11 }
 0x155   : > { %v4457_v35 = vpop.permute.xlu0 %2776 }
 0x156   : > { %4984 = vst [vmem:[#allocation55_spill] sm:$0xff] %v4457_v35  ;;  %v4459_v38 = vpop.permute.xlu1 %2785 }
 0x157   : > { %4985 = vst [vmem:[#allocation56_spill] sm:$0xff] %v4459_v38 }
 0x159   : > { %v4461_v54 = vpop.permute.xlu0 %2782 }
 0x15a   : > { %4986 = vst [vmem:[#allocation57_spill] sm:$0xff] %v4461_v54  ;;  %v4463_v48 = vpop.f32.mrf.mxu1  ;;  %v4465_v28 = vpop.permute.xlu1 %2791 }
 0x15b   : > { %4987 = vst [vmem:[#allocation58_spill] sm:$0xff] %v4465_v28  ;;  %2313 = vrot.lane.b32.xlu0 %v4463_v48, %s3401_s28  ;;  %v4483_v54 = vpop.f32.mrf.mxu0 }
 0x15c   : > { %v4469_v25 = vpop.f32.mrf.mxu1  ;;  %4993 = vst [vmem:[#allocation64_spill] sm:$0xff] %v4483_v54 }
 0x15d   : > { %4988 = vst [vmem:[#allocation59_spill] sm:$0xff] %v4469_v25  ;;  %v4471_v55 = vpop.permute.xlu0 %2788 }
 0x15e   : > { %4989 = vst [vmem:[#allocation60_spill] sm:$0xff] %v4471_v55  ;;  %v4473_v58 = vpop.f32.mrf.mxu1  ;;  %v4475_v11 = vpop.permute.xlu1 %2797 }
 0x15f   : > { %4990 = vst [vmem:[#allocation61_spill] sm:$0xff] %v4473_v58  ;;  %4991 = vst [vmem:[#allocation62_spill] sm:$0xff] %v4475_v11  ;;  %2277 = vrot.lane.b32.xlu0 %v4445_v22, %s3401_s28  ;;  %2315 = vrot.lane.b32.xlu1 %v4473_v58, %s3401_s28 }
 0x160   : > { %v4493_v11 = vpop.f32.mrf.mxu1 }
 0x161   : > { %v4481_v35 = vpop.permute.xlu0 %2794 }
 0x162   : > { %4992 = vst [vmem:[#allocation63_spill] sm:$0xff] %v4481_v35  ;;  %v4485_v38 = vpop.permute.xlu1 %2803 }
 0x163   : > { %4994 = vst [vmem:[#allocation65_spill] sm:$0xff] %v4485_v38  ;;  %2309 = vrot.lane.b32.xlu0 %v4469_v25, %s3401_s28  ;;  %2279 = vrot.lane.b32.xlu1 %v4483_v54, %s3401_s28 }
 0x165   : > { %v4491_v55 = vpop.permute.xlu0 %2800 }
 0x166   : > { %4995 = vst [vmem:[#allocation66_spill] sm:$0xff] %v4491_v55  ;;  %v4495_v28 = vpop.permute.xlu1 %2809 }
 0x167   : > { %4996 = vst [vmem:[#allocation67_spill] sm:$0xff] %v4495_v28  ;;  %2311 = vrot.lane.b32.xlu1 %v4493_v11, %s3401_s28 }
 0x169   : > { %v4499_v35 = vpop.permute.xlu0 %2806 }
 0x16a   : > { %4997 = vst [vmem:[#allocation68_spill] sm:$0xff] %v4499_v35  ;;  %v4501_v58 = vpop.permute.xlu1 %2815 }
 0x16b   : > { %4998 = vst [vmem:[#allocation69_spill] sm:$0xff] %v4501_v58 }
 0x16d   : > { %v4503_v38 = vpop.permute.xlu0 %2812 }
 0x16e   : > { %v4505_v22 = vpop.permute.xlu1 %2821 }
 0x16f   : > { %4999 = vst [vmem:[#allocation70_spill] sm:$0xff] %v4505_v22 }
 0x171   : > { %v4507_v25 = vpop.permute.xlu0 %2818 }
 0x172   : > { %v4509_v54 = vpop.permute.xlu1 %2827 }
 0x173   : > { %5000 = vst [vmem:[#allocation71_spill] sm:$0xff] %v4509_v54 }
 0x175   : > { %v4511_v55 = vpop.permute.xlu0 %2824 }
 0x176   : > { %v2260_v28 = vpop.permute.xlu1 %2259 }
 0x177   : > { %v2352_v42 = vsel %vm2192_vm3, %v4271_v30, %v2260_v28  ;;  %vm2199_vm3 = vcmp.eq.s32.totalorder %v4120_v62, 1 }
 0x178   : > { %2579 = vrot.lane.b32.xlu1 %v2352_v42, %s3401_s28 }
 0x179   : > { %v2258_v35 = vpop.permute.xlu0 %2257 }
 0x17a   : > { %v2351_v58 = vsel %vm2191_vm4, %v4262_v1, %v2258_v35  ;;  %v2292_v22 = vpop.permute.xlu1 %2291  ;;  %vm2200_vm4 = vcmp.eq.s32.totalorder %v4114_v18, 1 }
 0x17b   : > { %2577 = vrot.lane.b32.xlu0 %v2351_v58, %s3401_s28  ;;  %v2368_v54 = vsel %vm2208_vm5, %v4291_v57, %v2292_v22  ;;  %vm2215_vm5 = vcmp.eq.s32.totalorder %v4216_v17, 1 }
 0x17c   : > { %2611 = vrot.lane.b32.xlu1 %v2368_v54, %s3401_s28 }
 0x17d   : > { %v2290_v47 = vpop.permute.xlu0 %2289 }
 0x17e   : > { %v2367_v28 = vsel %vm2207_vm6, %v4283_v37, %v2290_v47  ;;  %v2256_v7 = vpop.permute.xlu1 %2255  ;;  %vm2197_vm6 = vcmp.eq.s32.totalorder %v4110_v5, 1 }
 0x17f   : > { %2609 = vrot.lane.b32.xlu0 %v2367_v28, %s3401_s28  ;;  %v2350_v42 = vsel %vm2190_vm7, %v4301_v15, %v2256_v7  ;;  %vm2216_vm7 = vcmp.eq.s32.totalorder %v4210_v34, 1 }
 0x180   : > { %2575 = vrot.lane.b32.xlu1 %v2350_v42, %s3401_s28 }
 0x181   : > { %v2254_v56 = vpop.permute.xlu0 %2253 }
 0x182   : > { %v2349_v58 = vsel %vm2189_vm8, %v4267_v60, %v2254_v56  ;;  %v2288_v52 = vpop.permute.xlu1 %2287  ;;  %vm2198_vm8 = vcmp.eq.s32.totalorder %v4104_v46, 1 }
 0x183   : > { %2573 = vrot.lane.b32.xlu0 %v2349_v58, %s3401_s28  ;;  %v2366_v54 = vsel %vm2206_vm9, %v4309_v19, %v2288_v52  ;;  %vm2213_vm9 = vcmp.eq.s32.totalorder %v4206_v9, 1 }
 0x184   : > { %2607 = vrot.lane.b32.xlu1 %v2366_v54, %s3401_s28 }
 0x185   : > { %v2286_v59 = vpop.permute.xlu0 %2285 }
 0x186   : > { %v2365_v35 = vsel %vm2205_vm10, %v4289_v32, %v2286_v59  ;;  %v2268_v39 = vpop.permute.xlu1 %2267  ;;  %vm2214_vm10 = vcmp.eq.s32.totalorder %v4200_v61, 1 }
 0x187   : > { %2605 = vrot.lane.b32.xlu0 %v2365_v35, %s3401_s28  ;;  %v2356_v22 = vsel %vm2196_vm11, %v4325_v8, %v2268_v39  ;;  %vm2203_vm11 = vcmp.eq.s32.totalorder %v4146_v45, 1  ;;  %v5001_v45 = vld [vmem:[#allocation3_spill] sm:$0xff] }
 0x188   : > { %2587 = vrot.lane.b32.xlu1 %v2356_v22, %s3401_s28 }
 0x189   : > { %v2266_v51 = vpop.permute.xlu0 %2265 }
 0x18a   : > { %v2355_v47 = vsel %vm2195_vm12, %v4313_v31, %v2266_v51  ;;  %vm2204_vm12 = vcmp.eq.s32.totalorder %v4136_v10, 1 }
 0x18b   : > { %2585 = vrot.lane.b32.xlu0 %v2355_v47, %s3401_s28 }
 0x18f   : > { %v2298_v14 = vpop.permute.xlu0 %2297 }
 0x190   : > { %v2371_v28 = vsel %vm2211_vm13, %v4339_v27, %v2298_v14  ;;  %vm2219_vm13 = vcmp.eq.s32.totalorder %v4244_v4, 1  ;;  %v5005_v4 = vld [vmem:[#allocation2_spill] sm:$0xff] }
 0x191   : > { %2617 = vrot.lane.b32.xlu0 %v2371_v28, %s3401_s28 }
 0x193   : > { %v2262_v20 = vpop.permute.xlu0 %2261  ;;  %v2300_v23 = vpop.permute.xlu1 %2299 }
 0x194   : > { %v2353_v7 = vsel %vm2193_vm14, %v4321_v49, %v2262_v20  ;;  %v2372_v42 = vsel %vm2212_vm15, %v4349_v2, %v2300_v23  ;;  %vm2201_vm14 = vcmp.eq.s32.totalorder %v5001_v45, 1 }
 0x195   : > { %2581 = vrot.lane.b32.xlu0 %v2353_v7, %s3401_s28  ;;  %2619 = vrot.lane.b32.xlu1 %v2372_v42, %s3401_s28  ;;  %v5002_v7 = vld [vmem:[#allocation6_spill] sm:$0xff] }
 0x196   : > { %vm2220_vm15 = vcmp.eq.s32.totalorder %v5002_v7, 1  ;;  %v5015_v7 = vld [vmem:[#allocation8_spill] sm:$0xff] }
 0x197   : > { %v2294_v33 = vpop.permute.xlu0 %2293  ;;  %v2264_v56 = vpop.permute.xlu1 %2263 }
 0x198   : > { %v2369_v36 = vsel %vm2209_vm1, %v4345_v53, %v2294_v33  ;;  %v2354_v29 = vsel %vm2194_vm0, %v4359_v13, %v2264_v56  ;;  %v5003_v56 = vld [vmem:[#allocation51_spill] sm:$0xff]  ;;  %vm2202_vm0 = vcmp.eq.s32.totalorder %v5005_v4, 1 }
 0x199   : > { %2613 = vrot.lane.b32.xlu0 %v2369_v36, %s3401_s28  ;;  %2583 = vrot.lane.b32.xlu1 %v2354_v29, %s3401_s28  ;;  %v5004_v36 = vld [vmem:[#allocation61_spill] sm:$0xff] }
 0x19b   : > { %v2296_v58 = vpop.permute.xlu1 %2295 }
 0x19c   : > { %v2370_v52 = vsel %vm2210_vm2, %v4369_v50, %v2296_v58  ;;  %v5006_v58 = vld [vmem:[#allocation5_spill] sm:$0xff] }
 0x19d   : > { %2615 = vrot.lane.b32.xlu1 %v2370_v52, %s3401_s28  ;;  %vm2217_vm1 = vcmp.eq.s32.totalorder %v5006_v58, 1  ;;  %v5017_v58 = vld [vmem:[#allocation24_spill] sm:$0xff] }
 0x1a1   : > { %v2274_v12 = vpop.permute.xlu0 %2273 }
 0x1a2   : > { %v2359_v6 = vsel %vm2199_vm3, %v4377_v41, %v2274_v12 }
 0x1a3   : > { %2593 = vrot.lane.b32.xlu0 %v2359_v6, %s3401_s28  ;;  %v5007_v6 = vld [vmem:[#allocation59_spill] sm:$0xff] }
 0x1a5   : > { %v2276_v54 = vpop.permute.xlu1 %2275 }
 0x1a6   : > { %v2360_v59 = vsel %vm2200_vm4, %v4387_v21, %v2276_v54 }
 0x1a7   : > { %2595 = vrot.lane.b32.xlu1 %v2360_v59, %s3401_s28  ;;  %v5008_v59 = vld [vmem:[#allocation64_spill] sm:$0xff] }
 0x1af   : > { %v2306_v16 = vpop.permute.xlu0 %2305 }
 0x1b0   : > { %v2375_v35 = vsel %vm2215_vm5, %v4401_v24, %v2306_v16 }
 0x1b1   : > { %2625 = vrot.lane.b32.xlu0 %v2375_v35, %s3401_s28  ;;  %v5009_v35 = vld [vmem:[#allocation4_spill] sm:$0xff] }
 0x1b2   : > { %vm2218_vm2 = vcmp.eq.s32.totalorder %v5009_v35, 1 }
 0x1b3   : > { %v2270_v62 = vpop.permute.xlu0 %2269  ;;  %v2308_v39 = vpop.permute.xlu1 %2307 }
 0x1b4   : > { %v2357_v18 = vsel %vm2197_vm6, %v4383_v63, %v2270_v62  ;;  %v2376_v22 = vsel %vm2216_vm7, %v4411_v0, %v2308_v39 }
 0x1b5   : > { %2589 = vrot.lane.b32.xlu0 %v2357_v18, %s3401_s28  ;;  %2627 = vrot.lane.b32.xlu1 %v2376_v22, %s3401_s28  ;;  %v5010_v18 = vld [vmem:[#allocation9_spill] sm:$0xff] }
 0x1b6   : > { %vm2512_vm3 = vcmp.eq.s32.totalorder %v5010_v18, 1 }
 0x1b7   : > { %v2302_v17 = vpop.permute.xlu0 %2301  ;;  %v2272_v51 = vpop.permute.xlu1 %2271 }
 0x1b8   : > { %v2373_v5 = vsel %vm2213_vm9, %v4407_v43, %v2302_v17  ;;  %v2358_v34 = vsel %vm2198_vm8, %v4421_v44, %v2272_v51  ;;  %v5011_v51 = vld [vmem:[#allocation10_spill] sm:$0xff]  ;;  %vm2509_vm8 = vcmp.eq.s32.totalorder %v5015_v7, 1 }
 0x1b9   : > { %2621 = vrot.lane.b32.xlu0 %v2373_v5, %s3401_s28  ;;  %2591 = vrot.lane.b32.xlu1 %v2358_v34, %s3401_s28  ;;  %vm2511_vm4 = vcmp.eq.s32.totalorder %v5011_v51, 1 }
 0x1bb   : > { %v2304_v47 = vpop.permute.xlu1 %2303 }
 0x1bc   : > { %v2374_v14 = vsel %vm2214_vm10, %v4431_v40, %v2304_v47  ;;  %v5012_v47 = vld [vmem:[#allocation25_spill] sm:$0xff]  ;;  %vm2525_vm10 = vcmp.eq.s32.totalorder %v5017_v58, 1 }
 0x1bd   : > { %2623 = vrot.lane.b32.xlu1 %v2374_v14, %s3401_s28  ;;  %vm2528_vm5 = vcmp.eq.s32.totalorder %v5012_v47, 1 }
 0x1bf   : > { %v2282_v46 = vpop.permute.xlu0 %2281 }
 0x1c0   : > { %v2363_v9 = vsel %vm2203_vm11, %v4439_v26, %v2282_v46 }
 0x1c1   : > { %2601 = vrot.lane.b32.xlu0 %v2363_v9, %s3401_s28  ;;  %v5013_v9 = vld [vmem:[#allocation26_spill] sm:$0xff] }
 0x1c2   : > { %vm2527_vm6 = vcmp.eq.s32.totalorder %v5013_v9, 1 }
 0x1c3   : > { %v2284_v28 = vpop.permute.xlu1 %2283 }
 0x1c4   : > { %v2364_v20 = vsel %vm2204_vm12, %v4449_v3, %v2284_v28 }
 0x1c5   : > { %2603 = vrot.lane.b32.xlu1 %v2364_v20, %s3401_s28 }
 0x1cd   : > { %v2314_v61 = vpop.permute.xlu0 %2313 }
 0x1ce   : > { %v2379_v23 = vsel %vm2219_vm13, %v4463_v48, %v2314_v61  ;;  %v5014_v61 = vld [vmem:[#allocation7_spill] sm:$0xff] }
 0x1cf   : > { %2633 = vrot.lane.b32.xlu0 %v2379_v23, %s3401_s28  ;;  %vm2510_vm7 = vcmp.eq.s32.totalorder %v5014_v61, 1 }
 0x1d1   : > { %v2278_v42 = vpop.permute.xlu0 %2277  ;;  %v2316_v33 = vpop.permute.xlu1 %2315 }
 0x1d2   : > { %v2361_v10 = vsel %vm2201_vm14, %v5003_v56, %v2278_v42  ;;  %v2380_v29 = vsel %vm2220_vm15, %v5004_v36, %v2316_v33 }
 0x1d3   : > { %2597 = vrot.lane.b32.xlu0 %v2361_v10, %s3401_s28  ;;  %2635 = vrot.lane.b32.xlu1 %v2380_v29, %s3401_s28  ;;  %v5016_v10 = vld [vmem:[#allocation23_spill] sm:$0xff] }
 0x1d4   : > { %vm2526_vm9 = vcmp.eq.s32.totalorder %v5016_v10, 1 }
 0x1d5   : > { %v2310_v52 = vpop.permute.xlu0 %2309  ;;  %v2280_v12 = vpop.permute.xlu1 %2279 }
 0x1d6   : > { %v2377_v54 = vsel %vm2217_vm1, %v5007_v6, %v2310_v52  ;;  %v2362_v16 = vsel %vm2202_vm0, %v5008_v59, %v2280_v12 }
 0x1d7   : > { %2629 = vrot.lane.b32.xlu0 %v2377_v54, %s3401_s28  ;;  %2599 = vrot.lane.b32.xlu1 %v2362_v16, %s3401_s28  ;;  %v5018_v54 = vld [vmem:[#allocation13_spill] sm:$0xff] }
 0x1d8   : > { %vm2516_vm11 = vcmp.eq.s32.totalorder %v5018_v54, 1 }
 0x1d9   : > { %v2312_v62 = vpop.permute.xlu1 %2311 }
 0x1da   : > { %v2378_v39 = vsel %vm2218_vm2, %v4493_v11, %v2312_v62  ;;  %v5019_v62 = vld [vmem:[#allocation14_spill] sm:$0xff] }
 0x1db   : > { %2631 = vrot.lane.b32.xlu1 %v2378_v39, %s3401_s28  ;;  %vm2515_vm12 = vcmp.eq.s32.totalorder %v5019_v62, 1 }
 0x1ea   : > { %v2580_v22 = vpop.permute.xlu1 %2579 }
 0x1eb   : > { %v2672_v17 = vsel %vm2512_vm3, %v4271_v30, %v2580_v22  ;;  %v5020_v22 = vld [vmem:[#allocation30_spill] sm:$0xff] }
 0x1ec   : > { %2899 = vrot.lane.b32.xlu1 %v2672_v17, %s3401_s28  ;;  %vm2531_vm13 = vcmp.eq.s32.totalorder %v5020_v22, 1 }
 0x1ed   : > { %v2578_v5 = vpop.permute.xlu0 %2577 }
 0x1ee   : > { %v2671_v34 = vsel %vm2511_vm4, %v4262_v1, %v2578_v5  ;;  %v2612_v14 = vpop.permute.xlu1 %2611  ;;  %v5021_v5 = vld [vmem:[#allocation12_spill] sm:$0xff] }
 0x1ef   : > { %2897 = vrot.lane.b32.xlu0 %v2671_v34, %s3401_s28  ;;  %v2688_v46 = vsel %vm2528_vm5, %v4291_v57, %v2612_v14  ;;  %vm2513_vm14 = vcmp.eq.s32.totalorder %v5021_v5, 1  ;;  %v5022_v34 = vld [vmem:[#allocation29_spill] sm:$0xff] }
 0x1f0   : > { %2931 = vrot.lane.b32.xlu1 %v2688_v46, %s3401_s28  ;;  %vm2532_vm15 = vcmp.eq.s32.totalorder %v5022_v34, 1  ;;  %v5031_v34 = vld [vmem:[#allocation15_spill] sm:$0xff] }
 0x1f1   : > { %v2610_v28 = vpop.permute.xlu0 %2609 }
 0x1f2   : > { %v2687_v20 = vsel %vm2527_vm6, %v4283_v37, %v2610_v28  ;;  %v2576_v23 = vpop.permute.xlu1 %2575  ;;  %v5023_v28 = vld [vmem:[#allocation11_spill] sm:$0xff] }
 0x1f3   : > { %2929 = vrot.lane.b32.xlu0 %v2687_v20, %s3401_s28  ;;  %v2670_v45 = vsel %vm2510_vm7, %v4301_v15, %v2576_v23  ;;  %vm2514_vm0 = vcmp.eq.s32.totalorder %v5023_v28, 1  ;;  %v5024_v20 = vld [vmem:[#allocation28_spill] sm:$0xff] }
 0x1f4   : > { %2895 = vrot.lane.b32.xlu1 %v2670_v45, %s3401_s28  ;;  %vm2529_vm1 = vcmp.eq.s32.totalorder %v5024_v20, 1  ;;  %v5033_v20 = vld [vmem:[#allocation31_spill] sm:$0xff] }
 0x1f5   : > { %v2574_v42 = vpop.permute.xlu0 %2573 }
 0x1f6   : > { %v2669_v33 = vsel %vm2509_vm8, %v4267_v60, %v2574_v42  ;;  %v2608_v29 = vpop.permute.xlu1 %2607  ;;  %v5025_v42 = vld [vmem:[#allocation27_spill] sm:$0xff]  ;;  %vm2518_vm8 = vcmp.eq.s32.totalorder %v5031_v34, 1 }
 0x1f7   : > { %2893 = vrot.lane.b32.xlu0 %v2669_v33, %s3401_s28  ;;  %v2686_v4 = vsel %vm2526_vm9, %v4309_v19, %v2608_v29  ;;  %vm2530_vm2 = vcmp.eq.s32.totalorder %v5025_v42, 1  ;;  %v5026_v29 = vld [vmem:[#allocation18_spill] sm:$0xff] }
 0x1f8   : > { %2927 = vrot.lane.b32.xlu1 %v2686_v4, %s3401_s28  ;;  %vm2519_vm3 = vcmp.eq.s32.totalorder %v5026_v29, 1 }
 0x1f9   : > { %v2606_v52 = vpop.permute.xlu0 %2605 }
 0x1fa   : > { %v2685_v12 = vsel %vm2525_vm10, %v4289_v32, %v2606_v52  ;;  %v2588_v16 = vpop.permute.xlu1 %2587  ;;  %v5027_v52 = vld [vmem:[#allocation17_spill] sm:$0xff]  ;;  %vm2534_vm10 = vcmp.eq.s32.totalorder %v5033_v20, 1  ;;  %v4715_v20 = vld [vmem:[%s4919_s3] ss:$0 sm:$0xff] }
 0x1fb   : > { %2925 = vrot.lane.b32.xlu0 %v2685_v12, %s3401_s28  ;;  %v2676_v35 = vsel %vm2516_vm11, %v4325_v8, %v2588_v16  ;;  %vm2520_vm4 = vcmp.eq.s32.totalorder %v5027_v52, 1  ;;  %v5028_v16 = vld [vmem:[#allocation34_spill] sm:$0xff] }
 0x1fc   : > { %2907 = vrot.lane.b32.xlu1 %v2676_v35, %s3401_s28  ;;  %vm2535_vm5 = vcmp.eq.s32.totalorder %v5028_v16, 1  ;;  %v5037_v16 = vld [vmem:[#allocation19_spill] sm:$0xff] }
 0x1fd   : > { %v2586_v39 = vpop.permute.xlu0 %2585 }
 0x1fe   : > { %v2675_v18 = vsel %vm2515_vm12, %v4313_v31, %v2586_v39  ;;  %v5029_v39 = vld [vmem:[#allocation16_spill] sm:$0xff] }
 0x1ff   : > { %2905 = vrot.lane.b32.xlu0 %v2675_v18, %s3401_s28  ;;  %vm2517_vm6 = vcmp.eq.s32.totalorder %v5029_v39, 1  ;;  %v5030_v18 = vld [vmem:[#allocation33_spill] sm:$0xff] }
 0x200   : > { %vm2536_vm7 = vcmp.eq.s32.totalorder %v5030_v18, 1 }
 0x203   : > { %v2618_v17 = vpop.permute.xlu0 %2617 }
 0x204   : > { %v2691_v51 = vsel %vm2531_vm13, %v4339_v27, %v2618_v17 }
 0x205   : > { %2937 = vrot.lane.b32.xlu0 %v2691_v51, %s3401_s28 }
 0x207   : > { %v2582_v47 = vpop.permute.xlu0 %2581  ;;  %v2620_v14 = vpop.permute.xlu1 %2619 }
 0x208   : > { %v2673_v46 = vsel %vm2513_vm14, %v4321_v49, %v2582_v47  ;;  %v2692_v9 = vsel %vm2532_vm15, %v4349_v2, %v2620_v14  ;;  %v5032_v47 = vld [vmem:[#allocation32_spill] sm:$0xff]  ;;  %vm2522_vm14 = vcmp.eq.s32.totalorder %v5037_v16, 1 }
 0x209   : > { %2901 = vrot.lane.b32.xlu0 %v2673_v46, %s3401_s28  ;;  %2939 = vrot.lane.b32.xlu1 %v2692_v9, %s3401_s28  ;;  %vm2533_vm9 = vcmp.eq.s32.totalorder %v5032_v47, 1 }
 0x20b   : > { %v2614_v61 = vpop.permute.xlu0 %2613  ;;  %v2584_v23 = vpop.permute.xlu1 %2583 }
 0x20c   : > { %v2689_v45 = vsel %vm2529_vm1, %v4345_v53, %v2614_v61  ;;  %v2674_v7 = vsel %vm2514_vm0, %v4359_v13, %v2584_v23 }
 0x20d   : > { %2933 = vrot.lane.b32.xlu0 %v2689_v45, %s3401_s28  ;;  %2903 = vrot.lane.b32.xlu1 %v2674_v7, %s3401_s28  ;;  %v5034_v45 = vld [vmem:[#allocation22_spill] sm:$0xff] }
 0x20e   : > { %vm2523_vm11 = vcmp.eq.s32.totalorder %v5034_v45, 1  ;;  %v5043_v45 = vld [vmem:[#allocation42_spill] sm:$0xff] }
 0x20f   : > { %v2616_v33 = vpop.permute.xlu1 %2615 }
 0x210   : > { %v2690_v10 = vsel %vm2530_vm2, %v4369_v50, %v2616_v33  ;;  %v5035_v33 = vld [vmem:[#allocation21_spill] sm:$0xff] }
 0x211   : > { %2935 = vrot.lane.b32.xlu1 %v2690_v10, %s3401_s28  ;;  %vm2524_vm12 = vcmp.eq.s32.totalorder %v5035_v33, 1  ;;  %v3062_v33 = vld [vmem:[%s4709_s7 + $0x10] sm:$0xff] }
 0x215   : > { %v2594_v4 = vpop.permute.xlu0 %2593 }
 0x216   : > { %v2679_v58 = vsel %vm2519_vm3, %v4377_v41, %v2594_v4 }
 0x217   : > { %2913 = vrot.lane.b32.xlu0 %v2679_v58, %s3401_s28  ;;  %v5036_v58 = vld [vmem:[#allocation20_spill] sm:$0xff] }
 0x218   : > { %vm2521_vm13 = vcmp.eq.s32.totalorder %v5036_v58, 1 }
 0x219   : > { %v2596_v12 = vpop.permute.xlu1 %2595 }
 0x21a   : > { %v2680_v54 = vsel %vm2520_vm4, %v4387_v21, %v2596_v12  ;;  %vm2831_vm4 = vcmp.eq.s32.totalorder %v5043_v45, 1  ;;  %v3077_v45 = vld [vmem:[%s4709_s7 + $0x88] sm:$0xff] }
 0x21b   : > { %2915 = vrot.lane.b32.xlu1 %v2680_v54, %s3401_s28 }
 0x223   : > { %v2626_v35 = vpop.permute.xlu0 %2625 }
 0x224   : > { %v2695_v62 = vsel %vm2535_vm5, %v4401_v24, %v2626_v35  ;;  %v5038_v35 = vld [vmem:[#allocation36_spill] sm:$0xff] }
 0x225   : > { %2945 = vrot.lane.b32.xlu0 %v2695_v62, %s3401_s28  ;;  %vm2537_vm15 = vcmp.eq.s32.totalorder %v5038_v35, 1 }
 0x227   : > { %v2590_v22 = vpop.permute.xlu0 %2589  ;;  %v2628_v17 = vpop.permute.xlu1 %2627 }
 0x228   : > { %v2677_v51 = vsel %vm2517_vm6, %v4383_v63, %v2590_v22  ;;  %v2696_v5 = vsel %vm2536_vm7, %v4411_v0, %v2628_v17  ;;  %v5039_v17 = vld [vmem:[#allocation35_spill] sm:$0xff]  ;;  %vm3124_vm6 = vcmask 15360  }
 0x229   : > { %2909 = vrot.lane.b32.xlu0 %v2677_v51, %s3401_s28  ;;  %2947 = vrot.lane.b32.xlu1 %v2696_v5, %s3401_s28  ;;  %vm2538_vm0 = vcmp.eq.s32.totalorder %v5039_v17, 1  ;;  %v5040_v51 = vld [vmem:[#allocation38_spill] sm:$0xff] }
 0x22a   : > { %vm2539_vm1 = vcmp.eq.s32.totalorder %v5040_v51, 1  ;;  %v3061_v51 = vld [vmem:[%s4709_s7 + $0x8] sm:$0xff] }
 0x22b   : > { %v2622_v14 = vpop.permute.xlu0 %2621  ;;  %v2592_v46 = vpop.permute.xlu1 %2591 }
 0x22c   : > { %v2693_v9 = vsel %vm2533_vm9, %v4407_v43, %v2622_v14  ;;  %v2678_v28 = vsel %vm2518_vm8, %v4421_v44, %v2592_v46  ;;  %v5041_v14 = vld [vmem:[#allocation37_spill] sm:$0xff] }
 0x22d   : > { %2941 = vrot.lane.b32.xlu0 %v2693_v9, %s3401_s28  ;;  %2911 = vrot.lane.b32.xlu1 %v2678_v28, %s3401_s28  ;;  %vm2540_vm2 = vcmp.eq.s32.totalorder %v5041_v14, 1  ;;  %v5042_v9 = vld [vmem:[#allocation41_spill] sm:$0xff] }
 0x22e   : > { %vm2832_vm3 = vcmp.eq.s32.totalorder %v5042_v9, 1 }
 0x22f   : > { %v2624_v61 = vpop.permute.xlu1 %2623 }
 0x230   : > { %v2694_v23 = vsel %vm2534_vm10, %v4431_v40, %v2624_v61  ;;  %v3063_v61 = vld [vmem:[%s4709_s7 + $0x18] sm:$0xff] }
 0x231   : > { %2943 = vrot.lane.b32.xlu1 %v2694_v23, %s3401_s28 }
 0x233   : > { %v2602_v7 = vpop.permute.xlu0 %2601 }
 0x234   : > { %v2683_v42 = vsel %vm2523_vm11, %v4439_v26, %v2602_v7 }
 0x235   : > { %2921 = vrot.lane.b32.xlu0 %v2683_v42, %s3401_s28 }
 0x237   : > { %v2604_v10 = vpop.permute.xlu1 %2603 }
 0x238   : > { %v2684_v29 = vsel %vm2524_vm12, %v4449_v3, %v2604_v10 }
 0x239   : > { %2923 = vrot.lane.b32.xlu1 %v2684_v29, %s3401_s28  ;;  %v5044_v29 = vld [vmem:[#allocation58_spill] sm:$0xff] }
 0x23a   : > { %vm2848_vm5 = vcmp.eq.s32.totalorder %v5044_v29, 1  ;;  %v3076_v29 = vld [vmem:[%s4709_s7 + $0x80] sm:$0xff] }
 0x241   : > { %v2634_v4 = vpop.permute.xlu0 %2633 }
 0x242   : > { %v2699_v34 = vsel %vm2539_vm1, %v4463_v48, %v2634_v4 }
 0x245   : > { %v2598_v52 = vpop.permute.xlu0 %2597  ;;  %v2636_v12 = vpop.permute.xlu1 %2635 }
 0x246   : > { %v2681_v54 = vsel %vm2521_vm13, %v5003_v56, %v2598_v52  ;;  %v2700_v46 = vsel %vm2540_vm2, %v5004_v36, %v2636_v12 }
 0x247   : > { %2917 = vrot.lane.b32.xlu0 %v2681_v54, %s3401_s28  ;;  %v5045_v54 = vld [vmem:[#allocation60_spill] sm:$0xff] }
 0x248   : > { %vm2847_vm7 = vcmp.eq.s32.totalorder %v5045_v54, 1 }
 0x249   : > { %v2630_v62 = vpop.permute.xlu0 %2629  ;;  %v2600_v39 = vpop.permute.xlu1 %2599 }
 0x24a   : > { %v2697_v18 = vsel %vm2537_vm15, %v5007_v6, %v2630_v62  ;;  %v2682_v22 = vsel %vm2522_vm14, %v5008_v59, %v2600_v39  ;;  %v3078_v62 = vld [vmem:[%s4709_s7 + $0x90] sm:$0xff] }
 0x24b   : > { %2949 = vrot.lane.b32.xlu0 %v2697_v18, %s3401_s28  ;;  %2919 = vrot.lane.b32.xlu1 %v2682_v22, %s3401_s28  ;;  %v5046_v18 = vld [vmem:[#allocation39_spill] sm:$0xff] }
 0x24c   : > { %vm2830_vm8 = vcmp.eq.s32.totalorder %v5046_v18, 1 }
 0x24d   : > { %v2632_v5 = vpop.permute.xlu1 %2631 }
 0x24e   : > { %v2698_v47 = vsel %vm2538_vm0, %v4493_v11, %v2632_v5 }
 0x24f   : > { %2953 = vrot.lane.b32.xlu0 %v2699_v34, %s3401_s28  ;;  %2951 = vrot.lane.b32.xlu1 %v2698_v47, %s3401_s28  ;;  %v5047_v34 = vld [vmem:[#allocation40_spill] sm:$0xff] }
 0x250   : > { %vm2829_vm9 = vcmp.eq.s32.totalorder %v5047_v34, 1  ;;  %v5053_v34 = vld [vmem:[#allocation44_spill] sm:$0xff] }
 0x251   : > { %vm2833_vm15 = vcmp.eq.s32.totalorder %v5053_v34, 1 }
 0x253   : > { %2955 = vrot.lane.b32.xlu1 %v2700_v46, %s3401_s28  ;;  %v3060_v46 = vld [vmem:[%s4709_s7] sm:$0xff] }
 0x25e   : > { %v2900_v28 = vpop.permute.xlu1 %2899 }
 0x25f   : > { %v2992_v23 = vsel %vm2832_vm3, %v4271_v30, %v2900_v28  ;;  %v3079_v30 = vld [vmem:[%s4709_s7 + $0x98] sm:$0xff]  ;;  %v5048_v28 = vld [vmem:[#allocation56_spill] sm:$0xff] }
 0x260   : > { %v3031_v42 = vadd.f32 %v4715_v20, %v2992_v23  ;;  %vm2846_vm10 = vcmp.eq.s32.totalorder %v5048_v28, 1 }
 0x261   : > { %v2898_v7 = vpop.permute.xlu0 %2897 }
 0x262   : > { %v2991_v10 = vsel %vm2831_vm4, %v4262_v1, %v2898_v7  ;;  %v3095_v58 = vadd.f32 %v3063_v61, %v3031_v42  ;;  %v2932_v52 = vpop.permute.xlu1 %2931  ;;  %v5049_v42 = vld [vmem:[#allocation57_spill] sm:$0xff] }
 0x263   : > { %v3030_v4 = vadd.f32 %v4715_v20, %v2991_v10  ;;  %v3008_v12 = vsel %vm2848_vm5, %v4291_v57, %v2932_v52  ;;  %vm2845_vm11 = vcmp.eq.s32.totalorder %v5049_v42, 1 }
 0x264   : > { %3128 = vst.msk [vmem:[%s4728_s11 + $0x18] sm:$0xff] %vm3124_vm6, %v3095_v58  ;;  %v3047_v35 = vadd.f32 %v4715_v20, %v3008_v12  ;;  %v5050_v58 = vld [vmem:[#allocation45_spill] sm:$0xff] }
 0x265   : > { %v3094_v1 = vadd.f32 %v3062_v33, %v3030_v4  ;;  %v2930_v16 = vpop.permute.xlu0 %2929  ;;  %vm2836_vm12 = vcmp.eq.s32.totalorder %v5050_v58, 1  ;;  %v3067_v12 = vld [vmem:[%s4709_s7 + $0x38] sm:$0xff] }
 0x266   : > { %v3007_v39 = vsel %vm2847_vm7, %v4283_v37, %v2930_v16  ;;  %v3111_v22 = vadd.f32 %v3079_v30, %v3047_v35  ;;  %v2896_v17 = vpop.permute.xlu1 %2895  ;;  %vm2855_vm7 = vcmp.eq.s32.totalorder %v4503_v38, 1  ;;  %v3087_v38 = vld [vmem:[%s4709_s7 + $0xd8] sm:$0xff] }
 0x267   : > { %3127 = vst.msk [vmem:[%s4728_s11 + $0x10] sm:$0xff] %vm3124_vm6, %v3094_v1  ;;  %v3046_v57 = vadd.f32 %v4715_v20, %v3007_v39  ;;  %v2990_v5 = vsel %vm2830_vm8, %v4301_v15, %v2896_v17  ;;  %v5051_v1 = vld [vmem:[#allocation46_spill] sm:$0xff] }
 0x268   : > { %3144 = vst.msk [vmem:[%s4728_s11 + $0x98] sm:$0xff] %vm3124_vm6, %v3111_v22  ;;  %v3029_v37 = vadd.f32 %v4715_v20, %v2990_v5  ;;  %vm2835_vm13 = vcmp.eq.s32.totalorder %v5051_v1, 1  ;;  %v5052_v22 = vld [vmem:[#allocation66_spill] sm:$0xff] }
 0x269   : > { %v3110_v47 = vadd.f32 %v3078_v62, %v3046_v57  ;;  %v2894_v14 = vpop.permute.xlu0 %2893  ;;  %v3066_v62 = vld [vmem:[%s4709_s7 + $0x30] sm:$0xff]  ;;  %vm2851_vm14 = vcmp.eq.s32.totalorder %v5052_v22, 1  ;;  %v3071_v22 = vld [vmem:[%s4709_s7 + $0x58] sm:$0xff] }
 0x26a   : > { %v2989_v9 = vsel %vm2829_vm9, %v4267_v60, %v2894_v14  ;;  %v3093_v61 = vadd.f32 %v3061_v51, %v3029_v37  ;;  %v2928_v23 = vpop.permute.xlu1 %2927  ;;  %v3082_v51 = vld [vmem:[%s4709_s7 + $0xb0] sm:$0xff] }
 0x26b   : > { %3143 = vst.msk [vmem:[%s4728_s11 + $0x90] sm:$0xff] %vm3124_vm6, %v3110_v47  ;;  %v3028_v15 = vadd.f32 %v4715_v20, %v2989_v9  ;;  %v3006_v7 = vsel %vm2846_vm10, %v4309_v19, %v2928_v23  ;;  %v5054_v47 = vld [vmem:[#allocation65_spill] sm:$0xff]  ;;  %v3064_v9 = vld [vmem:[%s4709_s7 + $0x20] sm:$0xff] }
 0x26c   : > { %3126 = vst.msk [vmem:[%s4728_s11 + $0x8] sm:$0xff] %vm3124_vm6, %v3093_v61  ;;  %v3045_v60 = vadd.f32 %v4715_v20, %v3006_v7  ;;  %vm2852_vm0 = vcmp.eq.s32.totalorder %v5054_v47, 1  ;;  %v5056_v7 = vld [vmem:[#allocation63_spill] sm:$0xff] }
 0x26d   : > { %v3092_v33 = vadd.f32 %v3060_v46, %v3028_v15  ;;  %v2926_v10 = vpop.permute.xlu0 %2925  ;;  %v3083_v15 = vld [vmem:[%s4709_s7 + $0xb8] sm:$0xff]  ;;  %vm2849_vm2 = vcmp.eq.s32.totalorder %v5056_v7, 1 }
 0x26e   : > { %v3005_v4 = vsel %vm2845_vm11, %v4289_v32, %v2926_v10  ;;  %v3109_v52 = vadd.f32 %v3077_v45, %v3045_v60  ;;  %v2908_v30 = vpop.permute.xlu1 %2907  ;;  %v5055_v45 = vld [vmem:[#allocation43_spill] sm:$0xff]  ;;  %v3080_v60 = vld [vmem:[%s4709_s7 + $0xa0] sm:$0xff] }
 0x26f   : > { %3125 = vst.msk [vmem:[%s4728_s11] sm:$0xff] %vm3124_vm6, %v3092_v33  ;;  %v3044_v19 = vadd.f32 %v4715_v20, %v3005_v4  ;;  %v2996_v54 = vsel %vm2836_vm12, %v4325_v8, %v2908_v30  ;;  %vm2834_vm1 = vcmp.eq.s32.totalorder %v5055_v45, 1  ;;  %v5063_v45 = vld [vmem:[#allocation68_spill] sm:$0xff] }
 0x270   : > { %3142 = vst.msk [vmem:[%s4728_s11 + $0x88] sm:$0xff] %vm3124_vm6, %v3109_v52  ;;  %v3035_v32 = vadd.f32 %v4715_v20, %v2996_v54  ;;  %v5057_v52 = vld [vmem:[#allocation62_spill] sm:$0xff]  ;;  %vm2853_vm11 = vcmp.eq.s32.totalorder %v5063_v45, 1 }
 0x271   : > { %v3108_v16 = vadd.f32 %v3076_v29, %v3044_v19  ;;  %v2906_v35 = vpop.permute.xlu0 %2905  ;;  %v3065_v29 = vld [vmem:[%s4709_s7 + $0x28] sm:$0xff]  ;;  %vm2850_vm3 = vcmp.eq.s32.totalorder %v5057_v52, 1 }
 0x272   : > { %v2995_v39 = vsel %vm2835_vm13, %v4313_v31, %v2906_v35  ;;  %v3099_v57 = vadd.f32 %v3067_v12, %v3035_v32  ;;  %v5058_v35 = vld [vmem:[#allocation50_spill] sm:$0xff] }
 0x273   : > { %3141 = vst.msk [vmem:[%s4728_s11 + $0x80] sm:$0xff] %vm3124_vm6, %v3108_v16  ;;  %v3034_v18 = vadd.f32 %v4715_v20, %v2995_v39  ;;  %vm2839_vm4 = vcmp.eq.s32.totalorder %v5058_v35, 1 }
 0x274   : > { %3132 = vst.msk [vmem:[%s4728_s11 + $0x38] sm:$0xff] %vm3124_vm6, %v3099_v57 }
 0x275   : > { %v3098_v8 = vadd.f32 %v3066_v62, %v3034_v18  ;;  %v3070_v62 = vld [vmem:[%s4709_s7 + $0x50] sm:$0xff]  ;;  %v5059_v18 = vld [vmem:[#allocation49_spill] sm:$0xff] }
 0x276   : > { %vm2840_vm5 = vcmp.eq.s32.totalorder %v5059_v18, 1 }
 0x277   : > { %3131 = vst.msk [vmem:[%s4728_s11 + $0x30] sm:$0xff] %vm3124_vm6, %v3098_v8  ;;  %v2938_v17 = vpop.permute.xlu0 %2937 }
 0x278   : > { %v3011_v5 = vsel %vm2851_vm14, %v4339_v27, %v2938_v17 }
 0x279   : > { %v3050_v31 = vadd.f32 %v4715_v20, %v3011_v5 }
 0x27b   : > { %v3114_v14 = vadd.f32 %v3082_v51, %v3050_v31  ;;  %v2902_v37 = vpop.permute.xlu0 %2901  ;;  %v2940_v46 = vpop.permute.xlu1 %2939  ;;  %v3086_v31 = vld [vmem:[%s4709_s7 + $0xd0] sm:$0xff] }
 0x27c   : > { %v2993_v28 = vsel %vm2833_vm15, %v4321_v49, %v2902_v37  ;;  %v3012_v61 = vsel %vm2852_vm0, %v4349_v2, %v2940_v46 }
 0x27d   : > { %3147 = vst.msk [vmem:[%s4728_s11 + $0xb0] sm:$0xff] %vm3124_vm6, %v3114_v14  ;;  %v3032_v27 = vadd.f32 %v4715_v20, %v2993_v28  ;;  %v3051_v23 = vadd.f32 %v4715_v20, %v3012_v61  ;;  %v5060_v14 = vld [vmem:[#allocation48_spill] sm:$0xff]  ;;  %v3068_v28 = vld [vmem:[%s4709_s7 + $0x40] sm:$0xff] }
 0x27e   : > { %vm2837_vm8 = vcmp.eq.s32.totalorder %v5060_v14, 1 }
 0x27f   : > { %v3096_v42 = vadd.f32 %v3064_v9, %v3032_v27  ;;  %v3115_v33 = vadd.f32 %v3083_v15, %v3051_v23  ;;  %v2934_v10 = vpop.permute.xlu0 %2933  ;;  %v2904_v49 = vpop.permute.xlu1 %2903  ;;  %v5062_v23 = vld [vmem:[#allocation47_spill] sm:$0xff] }
 0x280   : > { %v3009_v2 = vsel %vm2849_vm2, %v4345_v53, %v2934_v10  ;;  %v2994_v4 = vsel %vm2834_vm1, %v4359_v13, %v2904_v49  ;;  %v3081_v53 = vld [vmem:[%s4709_s7 + $0xa8] sm:$0xff]  ;;  %vm2838_vm10 = vcmp.eq.s32.totalorder %v5062_v23, 1  ;;  %v3084_v10 = vld [vmem:[%s4709_s7 + $0xc0] sm:$0xff]  ;;  %vm2857_vm1 = vcmp.eq.s32.totalorder %v4507_v25, 1 }
 0x281   : > { %3129 = vst.msk [vmem:[%s4728_s11 + $0x20] sm:$0xff] %vm3124_vm6, %v3096_v42  ;;  %3148 = vst.msk [vmem:[%s4728_s11 + $0xb8] sm:$0xff] %vm3124_vm6, %v3115_v33  ;;  %v3048_v58 = vadd.f32 %v4715_v20, %v3009_v2  ;;  %v3033_v19 = vadd.f32 %v4715_v20, %v2994_v4  ;;  %v3069_v49 = vld [vmem:[%s4709_s7 + $0x48] sm:$0xff]  ;;  %v5069_v25 = vld [vmem:[#allocation70_spill] sm:$0xff] }
 0x282   : > { %v5064_v4 = vld [vmem:[#allocation67_spill] sm:$0xff]  ;;  %vm2858_vm2 = vcmp.eq.s32.totalorder %v5069_v25, 1 }
 0x283   : > { %v3112_v30 = vadd.f32 %v3080_v60, %v3048_v58  ;;  %v3097_v12 = vadd.f32 %v3065_v29, %v3033_v19  ;;  %v2936_v54 = vpop.permute.xlu1 %2935  ;;  %vm2854_vm12 = vcmp.eq.s32.totalorder %v5064_v4, 1 }
 0x284   : > { %v3010_v1 = vsel %vm2850_vm3, %v4369_v50, %v2936_v54  ;;  %v5065_v54 = vld [vmem:[#allocation55_spill] sm:$0xff]  ;;  %vm2859_vm3 = vcmp.eq.s32.totalorder %v4511_v55, 1 }
 0x285   : > { %3145 = vst.msk [vmem:[%s4728_s11 + $0xa0] sm:$0xff] %vm3124_vm6, %v3112_v30  ;;  %3130 = vst.msk [vmem:[%s4728_s11 + $0x28] sm:$0xff] %vm3124_vm6, %v3097_v12  ;;  %v3049_v13 = vadd.f32 %v4715_v20, %v3010_v1  ;;  %vm2843_vm13 = vcmp.eq.s32.totalorder %v5065_v54, 1  ;;  %v3074_v1 = vld [vmem:[%s4709_s7 + $0x70] sm:$0xff] }
 0x287   : > { %v3113_v16 = vadd.f32 %v3081_v53, %v3049_v13 }
 0x289   : > { %v2914_v32 = vpop.permute.xlu0 %2913  ;;  %3146 = vst.msk [vmem:[%s4728_s11 + $0xa8] sm:$0xff] %vm3124_vm6, %v3113_v16  ;;  %v5066_v16 = vld [vmem:[#allocation54_spill] sm:$0xff] }
 0x28a   : > { %v2999_v39 = vsel %vm2839_vm4, %v4377_v41, %v2914_v32  ;;  %vm2844_vm14 = vcmp.eq.s32.totalorder %v5066_v16, 1 }
 0x28b   : > { %v3038_v50 = vadd.f32 %v4715_v20, %v2999_v39 }
 0x28d   : > { %v3102_v57 = vadd.f32 %v3070_v62, %v3038_v50  ;;  %v2916_v8 = vpop.permute.xlu1 %2915  ;;  %v3075_v62 = vld [vmem:[%s4709_s7 + $0x78] sm:$0xff] }
 0x28e   : > { %v3000_v17 = vsel %vm2840_vm5, %v4387_v21, %v2916_v8  ;;  %v5061_v21 = vld [vmem:[#allocation69_spill] sm:$0xff]  ;;  %v3072_v8 = vld [vmem:[%s4709_s7 + $0x60] sm:$0xff] }
 0x28f   : > { %3135 = vst.msk [vmem:[%s4728_s11 + $0x50] sm:$0xff] %vm3124_vm6, %v3102_v57  ;;  %v3039_v51 = vadd.f32 %v4715_v20, %v3000_v17  ;;  %vm2856_vm9 = vcmp.eq.s32.totalorder %v5061_v21, 1 }
 0x291   : > { %v3103_v5 = vadd.f32 %v3071_v22, %v3039_v51  ;;  %v5068_v51 = vld [vmem:[#allocation52_spill] sm:$0xff] }
 0x292   : > { %vm2842_vm0 = vcmp.eq.s32.totalorder %v5068_v51, 1 }
 0x293   : > { %3136 = vst.msk [vmem:[%s4728_s11 + $0x58] sm:$0xff] %vm3124_vm6, %v3103_v5 }
 0x297   : > { %v2946_v41 = vpop.permute.xlu0 %2945 }
 0x298   : > { %v3015_v34 = vsel %vm2855_vm7, %v4401_v24, %v2946_v41 }
 0x299   : > { %v3054_v47 = vadd.f32 %v4715_v20, %v3015_v34 }
 0x29b   : > { %v3118_v37 = vadd.f32 %v3086_v31, %v3054_v47  ;;  %v2910_v46 = vpop.permute.xlu0 %2909  ;;  %v2948_v9 = vpop.permute.xlu1 %2947  ;;  %v3088_v31 = vld [vmem:[%s4709_s7 + $0xe0] sm:$0xff]  ;;  %v3073_v47 = vld [vmem:[%s4709_s7 + $0x68] sm:$0xff] }
 0x29c   : > { %v2997_v15 = vsel %vm2837_vm8, %v4383_v63, %v2910_v46  ;;  %v3016_v61 = vsel %vm2856_vm9, %v4411_v0, %v2948_v9 }
 0x29d   : > { %3151 = vst.msk [vmem:[%s4728_s11 + $0xd0] sm:$0xff] %vm3124_vm6, %v3118_v37  ;;  %v3036_v24 = vadd.f32 %v4715_v20, %v2997_v15  ;;  %v3055_v27 = vadd.f32 %v4715_v20, %v3016_v61  ;;  %v3089_v15 = vld [vmem:[%s4709_s7 + $0xe8] sm:$0xff] }
 0x29f   : > { %v3100_v7 = vadd.f32 %v3068_v28, %v3036_v24  ;;  %v3119_v42 = vadd.f32 %v3087_v38, %v3055_v27  ;;  %v2942_v33 = vpop.permute.xlu0 %2941  ;;  %v2912_v63 = vpop.permute.xlu1 %2911  ;;  %v3090_v28 = vld [vmem:[%s4709_s7 + $0xf0] sm:$0xff]  ;;  %v5070_v24 = vld [vmem:[#allocation71_spill] sm:$0xff] }
 0x2a0   : > { %v3013_v0 = vsel %vm2853_vm11, %v4407_v43, %v2942_v33  ;;  %v2998_v60 = vsel %vm2838_vm10, %v4421_v44, %v2912_v63  ;;  %v3085_v43 = vld [vmem:[%s4709_s7 + $0xc8] sm:$0xff]  ;;  %vm2860_vm4 = vcmp.eq.s32.totalorder %v5070_v24, 1 }
 0x2a1   : > { %3133 = vst.msk [vmem:[%s4728_s11 + $0x40] sm:$0xff] %vm3124_vm6, %v3100_v7  ;;  %3152 = vst.msk [vmem:[%s4728_s11 + $0xd8] sm:$0xff] %vm3124_vm6, %v3119_v42  ;;  %v3052_v2 = vadd.f32 %v4715_v20, %v3013_v0  ;;  %v3037_v29 = vadd.f32 %v4715_v20, %v2998_v60  ;;  %v3091_v7 = vld [vmem:[%s4709_s7 + $0xf8] sm:$0xff] }
 0x2a3   : > { %v3116_v58 = vadd.f32 %v3084_v10, %v3052_v2  ;;  %v3101_v19 = vadd.f32 %v3069_v49, %v3037_v29  ;;  %v2944_v52 = vpop.permute.xlu1 %2943 }
 0x2a4   : > { %v3014_v30 = vsel %vm2854_vm12, %v4431_v40, %v2944_v52 }
 0x2a5   : > { %3149 = vst.msk [vmem:[%s4728_s11 + $0xc0] sm:$0xff] %vm3124_vm6, %v3116_v58  ;;  %3134 = vst.msk [vmem:[%s4728_s11 + $0x48] sm:$0xff] %vm3124_vm6, %v3101_v19  ;;  %v3053_v44 = vadd.f32 %v4715_v20, %v3014_v30 }
 0x2a7   : > { %v3117_v12 = vadd.f32 %v3085_v43, %v3053_v44  ;;  %v2922_v53 = vpop.permute.xlu0 %2921 }
 0x2a8   : > { %v3003_v13 = vsel %vm2843_vm13, %v4439_v26, %v2922_v53  ;;  %v5067_v26 = vld [vmem:[#allocation53_spill] sm:$0xff] }
 0x2a9   : > { %3150 = vst.msk [vmem:[%s4728_s11 + $0xc8] sm:$0xff] %vm3124_vm6, %v3117_v12  ;;  %v3042_v40 = vadd.f32 %v4715_v20, %v3003_v13  ;;  %vm2841_vm15 = vcmp.eq.s32.totalorder %v5067_v26, 1 }
 0x2ab   : > { %v3106_v35 = vadd.f32 %v3074_v1, %v3042_v40  ;;  %v2924_v32 = vpop.permute.xlu1 %2923 }
 0x2ac   : > { %v3004_v39 = vsel %vm2844_vm14, %v4449_v3, %v2924_v32 }
 0x2ad   : > { %3139 = vst.msk [vmem:[%s4728_s11 + $0x70] sm:$0xff] %vm3124_vm6, %v3106_v35  ;;  %v3043_v50 = vadd.f32 %v4715_v20, %v3004_v39 }
 0x2af   : > { %v3107_v18 = vadd.f32 %v3075_v62, %v3043_v50 }
 0x2b1   : > { %3140 = vst.msk [vmem:[%s4728_s11 + $0x78] sm:$0xff] %vm3124_vm6, %v3107_v18 }
 0x2b9   : > { %v2918_v57 = vpop.permute.xlu0 %2917 }
 0x2ba   : > { %v3001_v22 = vsel %vm2841_vm15, %v5003_v56, %v2918_v57 }
 0x2bb   : > { %v3040_v17 = vadd.f32 %v4715_v20, %v3001_v22 }
 0x2bd   : > { %v3104_v3 = vadd.f32 %v3072_v8, %v3040_v17  ;;  %v2950_v5 = vpop.permute.xlu0 %2949  ;;  %v2920_v41 = vpop.permute.xlu1 %2919 }
 0x2be   : > { %v3017_v34 = vsel %vm2857_vm1, %v5007_v6, %v2950_v5  ;;  %v3002_v14 = vsel %vm2842_vm0, %v5008_v59, %v2920_v41 }
 0x2bf   : > { %3137 = vst.msk [vmem:[%s4728_s11 + $0x60] sm:$0xff] %vm3124_vm6, %v3104_v3  ;;  %v3056_v56 = vadd.f32 %v4715_v20, %v3017_v34  ;;  %v3041_v21 = vadd.f32 %v4715_v20, %v3002_v14 }
 0x2c1   : > { %v3120_v37 = vadd.f32 %v3088_v31, %v3056_v56  ;;  %v3105_v46 = vadd.f32 %v3073_v47, %v3041_v21  ;;  %v2954_v9 = vpop.permute.xlu0 %2953  ;;  %v2952_v6 = vpop.permute.xlu1 %2951 }
 0x2c2   : > { %v3019_v59 = vsel %vm2859_vm3, %v4463_v48, %v2954_v9  ;;  %v3018_v38 = vsel %vm2858_vm2, %v4493_v11, %v2952_v6 }
 0x2c3   : > { %3153 = vst.msk [vmem:[%s4728_s11 + $0xe0] sm:$0xff] %vm3124_vm6, %v3120_v37  ;;  %3138 = vst.msk [vmem:[%s4728_s11 + $0x68] sm:$0xff] %vm3124_vm6, %v3105_v46  ;;  %v3058_v55 = vadd.f32 %v4715_v20, %v3019_v59  ;;  %v3057_v61 = vadd.f32 %v4715_v20, %v3018_v38 }
 0x2c5   : > { %v3122_v27 = vadd.f32 %v3090_v28, %v3058_v55  ;;  %v3121_v23 = vadd.f32 %v3089_v15, %v3057_v61  ;;  %v2956_v45 = vpop.permute.xlu1 %2955 }
 0x2c6   : > { %v3020_v48 = vsel %vm2860_vm4, %v5004_v36, %v2956_v45 }
 0x2c7   : > { %3155 = vst.msk [vmem:[%s4728_s11 + $0xf0] sm:$0xff] %vm3124_vm6, %v3122_v27  ;;  %3154 = vst.msk [vmem:[%s4728_s11 + $0xe8] sm:$0xff] %vm3124_vm6, %v3121_v23  ;;  %v3059_v11 = vadd.f32 %v4715_v20, %v3020_v48 }
 0x2c9   : > { %v3123_v42 = vadd.f32 %v3091_v7, %v3059_v11 }
 0x2cb   : > { %3156 = vst.msk [vmem:[%s4728_s11 + $0xf8] sm:$0xff] %vm3124_vm6, %v3123_v42 }
 0x2cc PF: > { %s15_s18 = sadd.s32 1, %s3397_s18  }
 0x2cd   : > { %p12_p4 = scmp.ge.s32.totalorder %s15_s18, 4  }
 0x2cf   :  { %14 = sbr.rel (!%p12_p4) target bundleno = 1 (0x1), region = 73 }

</bundles_post_ra>
